<compile_context>
chip_gen: v5e
topology: v5e:2x2
jax: 0.10.0
libtpu: 0.0.40
codegen_flags: <defaults>
</compile_context>

<pallas_src>
import functools

import jax
import jax.numpy as jnp
from jax import lax
from jax.experimental import pallas as pl
from jax.experimental.pallas import tpu as pltpu

_LANE = 128
_SUB_ROWS = 256           # rows per inner sub-chunk (keeps h in vregs)
_DEFAULT_BLOCK_B = 4096   # batch rows per grid step (amortizes ~0.35us/step)
_VMEM_LIMIT = 32 * 1024 * 1024


def _round_up(x, m):
    return (x + m - 1) // m * m


def _pick_tile(batch, block_b, sub):
    """Batch-tile size: >=2 grid steps whenever B > 8 (v7x megacore), sub-aligned."""
    if batch <= 8:
        return batch                       # tiny batch: block == full array dim
    half = -(-batch // 2)                  # ceil(batch / 2)
    if half <= sub:
        return _round_up(half, 8)
    return min(block_b, _round_up(half, sub))


def _nerf_mlp_kernel(x_ref, w1_ref, b1_ref, w2_ref, b2_ref,
                     e_ref, m_ref, s_ref, *, sub_rows, d_out):
    """One batch tile of: h = relu(x @ W1 + b1); out = h @ W2 + b2; channel split.

    The tile is processed in `sub_rows` chunks inside an unrolled fori_loop so
    the f32 hidden activation (sub_rows, 128) never materializes as a spilled
    (tb, 128) VMEM intermediate.  Both matmuls run on the MXU in the weight
    dtype (bf16 on v5e/v6e/v7x; f32 for the test path) with f32 accumulation;
    bias, ReLU, sigmoid and the channel split stay in f32 (native v5e VPU/EUP).
    """
    cdt = w1_ref.dtype
    n_sub = x_ref.shape[0] // sub_rows

    def body(i, carry):
        r0 = pl.multiple_of(i * sub_rows, sub_rows)
        x = x_ref[pl.ds(r0, sub_rows), :]                         # (sub, d_in)
        h = jnp.dot(x, w1_ref[...], preferred_element_type=jnp.float32)
        h = jnp.maximum(h + b1_ref[...], 0.0)                     # f32
        out = jnp.dot(h.astype(cdt), w2_ref[...],
                      preferred_element_type=jnp.float32)
        out = out + b2_ref[...]                                   # (sub, d_out) f32

        e_ref[pl.ds(r0, sub_rows), :] = out[:, :3].astype(e_ref.dtype)
        if d_out >= 6:
            m_ref[pl.ds(r0, sub_rows), :] = out[:, 3:6].astype(m_ref.dtype)
        else:
            m_ref[pl.ds(r0, sub_rows), :] = (out[:, :3] * 0.1).astype(m_ref.dtype)
        if d_out >= 7:
            s_ref[pl.ds(r0, sub_rows), :] = out[:, 6:7].astype(s_ref.dtype)
        else:
            s_ref[pl.ds(r0, sub_rows), :] = jax.nn.sigmoid(
                out[:, 0:1]).astype(s_ref.dtype)
        return carry

    lax.fori_loop(0, n_sub, body, None, unroll=True)


def nerf_model_adapter_forward(params, positions, frequencies, times,
                               dynamic_objects, *,
                               block_b=_DEFAULT_BLOCK_B,
                               mxu_dtype=jnp.bfloat16):
    """JAX equivalent of NeRFModelAdapter.forward (tensor-result branch)."""
    w1, b1, w2, b2 = params
    B = positions.shape[0]
    d_in = (positions.shape[-1] + frequencies.shape[-1]
            + times.shape[-1] + dynamic_objects.shape[-1])
    hidden = w1.shape[1]
    d_out = w2.shape[1]
    assert w1.shape[0] == d_in, "W1 rows must match concatenated feature width"
    assert d_out >= 3, "adapter needs at least 3 output channels"

    # Single fused HBM pass: concat the four inputs AND cast to the MXU dtype.
    # Layer 1 then runs as one K=d_in matmul (no lane-sparse partial dots), and
    # bf16 halves the per-row input DMA.
    x_cat = jnp.concatenate(
        [positions, frequencies, times, dynamic_objects], axis=-1
    ).astype(mxu_dtype)

    # One-time weight prep (tiny, constant under jit): zero-pad hidden to the
    # 128-lane vreg width so activations / W2 rows are lane-dense.
    h_pad = _round_up(hidden, _LANE)
    w1_p = jnp.pad(w1.astype(jnp.float32),
                   ((0, 0), (0, h_pad - hidden))).astype(mxu_dtype)
    b1_p = jnp.pad(b1.reshape(1, hidden).astype(jnp.float32),
                   ((0, 0), (0, h_pad - hidden)))
    w2_p = jnp.pad(w2.astype(jnp.float32),
                   ((0, h_pad - hidden), (0, 0))).astype(mxu_dtype)
    b2_p = b2.reshape(1, d_out).astype(jnp.float32)

    # Batch tiling.  VMEM per step (double-buffered, 128-lane padding included):
    #   x: 2 * tb*128*itemsize ; outputs: 3 * 2 * tb*128*4  ->  ~14 MiB at
    # tb=4096 / bf16, which fits the explicit 32 MiB scoped limit everywhere.
    tb = _pick_tile(B, block_b, _SUB_ROWS)
    sub = min(_SUB_ROWS, tb)
    assert tb % sub == 0
    grid = (pl.cdiv(B, tb),)

    itemsize = jnp.dtype(mxu_dtype).itemsize
    cost = pl.CostEstimate(
        flops=2 * B * (d_in * h_pad + h_pad * d_out),
        transcendentals=0,
        bytes_accessed=(B * d_in * itemsize                       # activations in
                        + (d_in * h_pad + h_pad * d_out) * itemsize  # weights
                        + (h_pad + d_out) * 4                      # biases
                        + B * 7 * 4),                              # 3 outputs
    )

    def const_spec(shape):
        # Weights/biases stay VMEM-resident across all grid steps.
        return pl.BlockSpec(shape, lambda i: (0, 0))

    kernel = functools.partial(_nerf_mlp_kernel, sub_rows=sub, d_out=d_out)

    e, m, s = pl.pallas_call(
        kernel,
        out_shape=(jax.ShapeDtypeStruct((B, 3), jnp.float32),
                   jax.ShapeDtypeStruct((B, 3), jnp.float32),
                   jax.ShapeDtypeStruct((B, 1), jnp.float32)),
        grid=grid,
        in_specs=[
            pl.BlockSpec((tb, d_in), lambda i: (i, 0)),   # packed activations
            const_spec((d_in, h_pad)),                    # W1
            const_spec((1, h_pad)),                       # b1 (f32)
            const_spec((h_pad, d_out)),                   # W2
            const_spec((1, d_out)),                       # b2 (f32)
        ],
        out_specs=(pl.BlockSpec((tb, 3), lambda i: (i, 0)),
                   pl.BlockSpec((tb, 3), lambda i: (i, 0)),
                   pl.BlockSpec((tb, 1), lambda i: (i, 0))),
        compiler_params=pltpu.CompilerParams(
            dimension_semantics=("parallel",),            # megacore batch sharding
            vmem_limit_bytes=_VMEM_LIMIT),
        cost_estimate=cost,
    )(x_cat, w1_p, b1_p, w2_p, b2_p)

    return {
        "electric_field": e,
        "magnetic_field": m,
        "scattering_coefficient": s,
    }
    # TODO(synk): the PyTorch adapter's torch.randn / try-except fallback paths
    # are host-side control flow with no Pallas equivalent; only the
    # tensor-result branch (actual model inference) is implemented.


def init_params(key, d_in, hidden, d_out):
    k1, k2, k3, k4 = jax.random.split(key, 4)
    w1 = jax.random.normal(k1, (d_in, hidden), jnp.float32) * 0.1
    b1 = jax.random.normal(k2, (1, hidden), jnp.float32) * 0.01
    w2 = jax.random.normal(k3, (hidden, d_out), jnp.float32) * 0.1
    b2 = jax.random.normal(k4, (1, d_out), jnp.float32) * 0.01
    return (w1, b1, w2, b2)


def _reference(params, positions, frequencies, times, dynamic_objects):
    x = jnp.concatenate([positions, frequencies, times, dynamic_objects], axis=-1)
    w1, b1, w2, b2 = params
    return jnp.maximum(x @ w1 + b1, 0.0) @ w2 + b2


if __name__ == "__main__":
    key = jax.random.PRNGKey(0)
    k_pos, k_freq, k_time, k_dyn, k_params = jax.random.split(key, 5)

    P, F, T, D = 3, 4, 1, 8          # xyz / freq feats / time scalar / dyn feats
    HIDDEN = 32
    D_OUT = 8                        # >= 7 so E / B / scattering channels exist
    params = init_params(k_params, P + F + T + D, HIDDEN, D_OUT)

    def make_inputs(batch):
        kp, kf, kt, kd = jax.random.split(jax.random.PRNGKey(batch), 4)
        return (jax.random.normal(kp, (batch, P), jnp.float32),
                jax.random.normal(kf, (batch, F), jnp.float32),
                jax.random.normal(kt, (batch, T), jnp.float32),
                jax.random.normal(kd, (batch, D), jnp.float32))

    def check(out, ref, atol, rtol):
        assert out["electric_field"].shape == (ref.shape[0], 3)
        assert out["magnetic_field"].shape == (ref.shape[0], 3)
        assert out["scattering_coefficient"].shape == (ref.shape[0], 1)
        assert jnp.allclose(out["electric_field"], ref[:, :3], atol=atol, rtol=rtol)
        assert jnp.allclose(out["magnetic_field"], ref[:, 3:6], atol=atol, rtol=rtol)
        assert jnp.allclose(out["scattering_coefficient"], ref[:, 6:7],
                            atol=atol, rtol=rtol)

    # 1) f32-MXU path, B=1024 -> tb=512, 2 grid steps, 2 inner sub-chunks
    #    (exercises tiling + the unrolled sub-chunk loop), tight tolerance.
    inputs = make_inputs(1024)
    ref = _reference(params, *inputs)
    out_f32 = nerf_model_adapter_forward(params, *inputs, mxu_dtype=jnp.float32)
    jax.block_until_ready(out_f32)
    check(out_f32, ref, atol=1e-4, rtol=1e-4)

    # 2) default perf path (bf16 MXU operands), same inputs, loose tolerance.
    out_bf16 = nerf_model_adapter_forward(params, *inputs)
    jax.block_until_ready(out_bf16)
    check(out_bf16, ref, atol=5e-2, rtol=5e-2)

    # 3) tiny batch (exercises the ragged / small-tile path), f32, tight tol.
    tiny = make_inputs(16)
    ref_t = _reference(params, *tiny)
    out_t = nerf_model_adapter_forward(params, *tiny, mxu_dtype=jnp.float32)
    jax.block_until_ready(out_t)
    check(out_t, ref_t, atol=1e-4, rtol=1e-4)

    print("KERNEL_OK")
</pallas_src>

<mosaic_0001>
module attributes {stable_mosaic.version = 11 : i64} {
  func.func @_nerf_mlp_kernel(%arg0: i32, %arg1: memref<512x16xf32, #tpu.memory_space<vmem>>, %arg2: memref<16x128xf32, #tpu.memory_space<vmem>>, %arg3: memref<1x128xf32, #tpu.memory_space<vmem>>, %arg4: memref<128x8xf32, #tpu.memory_space<vmem>>, %arg5: memref<1x8xf32, #tpu.memory_space<vmem>>, %arg6: memref<512x3xf32, #tpu.memory_space<vmem>>, %arg7: memref<512x3xf32, #tpu.memory_space<vmem>>, %arg8: memref<512x1xf32, #tpu.memory_space<vmem>>) attributes {dimension_semantics = [#tpu.dimension_semantics<parallel>], iteration_bounds = array<i64: 2>, scalar_prefetch = 0 : i64, scratch_operands = 0 : i64, tpu.core_type = #tpu.core_type<tc>, window_params = [{transform_indices = @transform_0, window_bounds = array<i64: 512, 16>}, {pipeline_mode = #tpu.pipeline_mode<synchronous>, transform_indices = @transform_1, window_bounds = array<i64: 16, 128>}, {pipeline_mode = #tpu.pipeline_mode<synchronous>, transform_indices = @transform_2, window_bounds = array<i64: 1, 128>}, {pipeline_mode = #tpu.pipeline_mode<synchronous>, transform_indices = @transform_3, window_bounds = array<i64: 128, 8>}, {pipeline_mode = #tpu.pipeline_mode<synchronous>, transform_indices = @transform_4, window_bounds = array<i64: 1, 8>}, {transform_indices = @transform_5, window_bounds = array<i64: 512, 3>}, {transform_indices = @transform_6, window_bounds = array<i64: 512, 3>}, {transform_indices = @transform_7, window_bounds = array<i64: 512, 1>}]} {
    %c0_i32 = arith.constant 0 : i32
    %c256_i32 = arith.constant 256 : i32
    %0 = arith.muli %c0_i32, %c256_i32 : i32
    %1 = tpu.assume_multiple %0, 256 : i32
    %2 = arith.index_cast %1 : i32 to index
    %c0 = arith.constant 0 : index
    %3 = vector.load %arg1[%2, %c0] : memref<512x16xf32, #tpu.memory_space<vmem>>, vector<256x16xf32>
    %c0_0 = arith.constant 0 : index
    %c0_1 = arith.constant 0 : index
    %4 = vector.load %arg2[%c0_0, %c0_1] : memref<16x128xf32, #tpu.memory_space<vmem>>, vector<16x128xf32>
    %cst = arith.constant dense<0.000000e+00> : vector<256x128xf32>
    %5 = tpu.matmul %3, %4, %cst {dimension_numbers = #tpu.dot_dimension_numbers<[1], [0], [0], [1], [0, 0, 1, 1], [], []>} : vector<256x16xf32>, vector<16x128xf32>, vector<256x128xf32> -> vector<256x128xf32>
    %c0_2 = arith.constant 0 : index
    %c0_3 = arith.constant 0 : index
    %6 = vector.load %arg3[%c0_2, %c0_3] : memref<1x128xf32, #tpu.memory_space<vmem>>, vector<1x128xf32>
    %7 = vector.broadcast %6 : vector<1x128xf32> to vector<256x128xf32>
    %8 = arith.addf %5, %7 : vector<256x128xf32>
    %cst_4 = arith.constant 0.000000e+00 : f32
    %9 = vector.broadcast %cst_4 : f32 to vector<256x128xf32>
    %10 = arith.maximumf %8, %9 : vector<256x128xf32>
    %c0_5 = arith.constant 0 : index
    %c0_6 = arith.constant 0 : index
    %11 = vector.load %arg4[%c0_5, %c0_6] : memref<128x8xf32, #tpu.memory_space<vmem>>, vector<128x8xf32>
    %cst_7 = arith.constant dense<0.000000e+00> : vector<256x8xf32>
    %12 = tpu.matmul %10, %11, %cst_7 {dimension_numbers = #tpu.dot_dimension_numbers<[1], [0], [0], [1], [0, 0, 1, 1], [], []>} : vector<256x128xf32>, vector<128x8xf32>, vector<256x8xf32> -> vector<256x8xf32>
    %c0_8 = arith.constant 0 : index
    %c0_9 = arith.constant 0 : index
    %13 = vector.load %arg5[%c0_8, %c0_9] : memref<1x8xf32, #tpu.memory_space<vmem>>, vector<1x8xf32>
    %14 = vector.broadcast %13 : vector<1x8xf32> to vector<256x8xf32>
    %15 = arith.addf %12, %14 : vector<256x8xf32>
    %16 = vector.extract_strided_slice %15 {offsets = [0, 0], sizes = [256, 3], strides = [1, 1]} : vector<256x8xf32> to vector<256x3xf32>
    %17 = arith.index_cast %1 : i32 to index
    %c0_10 = arith.constant 0 : index
    %18 = vector.load %arg6[%17, %c0_10] : memref<512x3xf32, #tpu.memory_space<vmem>>, vector<256x3xf32>
    tpu.vector_store %arg6[%17, %c0_10], %16 {strides = array<i32>} : memref<512x3xf32, #tpu.memory_space<vmem>>, vector<256x3xf32>,
    %19 = vector.extract_strided_slice %15 {offsets = [0, 3], sizes = [256, 3], strides = [1, 1]} : vector<256x8xf32> to vector<256x3xf32>
    %20 = arith.index_cast %1 : i32 to index
    %c0_11 = arith.constant 0 : index
    %21 = vector.load %arg7[%20, %c0_11] : memref<512x3xf32, #tpu.memory_space<vmem>>, vector<256x3xf32>
    tpu.vector_store %arg7[%20, %c0_11], %19 {strides = array<i32>} : memref<512x3xf32, #tpu.memory_space<vmem>>, vector<256x3xf32>,
    %22 = vector.extract_strided_slice %15 {offsets = [0, 6], sizes = [256, 1], strides = [1, 1]} : vector<256x8xf32> to vector<256x1xf32>
    %23 = arith.index_cast %1 : i32 to index
    %c0_12 = arith.constant 0 : index
    %24 = vector.load %arg8[%23, %c0_12] : memref<512x1xf32, #tpu.memory_space<vmem>>, vector<256x1xf32>
    tpu.vector_store %arg8[%23, %c0_12], %22 {strides = array<i32>} : memref<512x1xf32, #tpu.memory_space<vmem>>, vector<256x1xf32>,
    %c1_i32 = arith.constant 1 : i32
    %c256_i32_13 = arith.constant 256 : i32
    %25 = arith.muli %c1_i32, %c256_i32_13 : i32
    %26 = tpu.assume_multiple %25, 256 : i32
    %27 = arith.index_cast %26 : i32 to index
    %c0_14 = arith.constant 0 : index
    %28 = vector.load %arg1[%27, %c0_14] : memref<512x16xf32, #tpu.memory_space<vmem>>, vector<256x16xf32>
    %c0_15 = arith.constant 0 : index
    %c0_16 = arith.constant 0 : index
    %29 = vector.load %arg2[%c0_15, %c0_16] : memref<16x128xf32, #tpu.memory_space<vmem>>, vector<16x128xf32>
    %cst_17 = arith.constant dense<0.000000e+00> : vector<256x128xf32>
    %30 = tpu.matmul %28, %29, %cst_17 {dimension_numbers = #tpu.dot_dimension_numbers<[1], [0], [0], [1], [0, 0, 1, 1], [], []>} : vector<256x16xf32>, vector<16x128xf32>, vector<256x128xf32> -> vector<256x128xf32>
    %c0_18 = arith.constant 0 : index
    %c0_19 = arith.constant 0 : index
    %31 = vector.load %arg3[%c0_18, %c0_19] : memref<1x128xf32, #tpu.memory_space<vmem>>, vector<1x128xf32>
    %32 = vector.broadcast %31 : vector<1x128xf32> to vector<256x128xf32>
    %33 = arith.addf %30, %32 : vector<256x128xf32>
    %cst_20 = arith.constant 0.000000e+00 : f32
    %34 = vector.broadcast %cst_20 : f32 to vector<256x128xf32>
    %35 = arith.maximumf %33, %34 : vector<256x128xf32>
    %c0_21 = arith.constant 0 : index
    %c0_22 = arith.constant 0 : index
    %36 = vector.load %arg4[%c0_21, %c0_22] : memref<128x8xf32, #tpu.memory_space<vmem>>, vector<128x8xf32>
    %cst_23 = arith.constant dense<0.000000e+00> : vector<256x8xf32>
    %37 = tpu.matmul %35, %36, %cst_23 {dimension_numbers = #tpu.dot_dimension_numbers<[1], [0], [0], [1], [0, 0, 1, 1], [], []>} : vector<256x128xf32>, vector<128x8xf32>, vector<256x8xf32> -> vector<256x8xf32>
    %c0_24 = arith.constant 0 : index
    %c0_25 = arith.constant 0 : index
    %38 = vector.load %arg5[%c0_24, %c0_25] : memref<1x8xf32, #tpu.memory_space<vmem>>, vector<1x8xf32>
    %39 = vector.broadcast %38 : vector<1x8xf32> to vector<256x8xf32>
    %40 = arith.addf %37, %39 : vector<256x8xf32>
    %41 = vector.extract_strided_slice %40 {offsets = [0, 0], sizes = [256, 3], strides = [1, 1]} : vector<256x8xf32> to vector<256x3xf32>
    %42 = arith.index_cast %26 : i32 to index
    %c0_26 = arith.constant 0 : index
    %43 = vector.load %arg6[%42, %c0_26] : memref<512x3xf32, #tpu.memory_space<vmem>>, vector<256x3xf32>
    tpu.vector_store %arg6[%42, %c0_26], %41 {strides = array<i32>} : memref<512x3xf32, #tpu.memory_space<vmem>>, vector<256x3xf32>,
    %44 = vector.extract_strided_slice %40 {offsets = [0, 3], sizes = [256, 3], strides = [1, 1]} : vector<256x8xf32> to vector<256x3xf32>
    %45 = arith.index_cast %26 : i32 to index
    %c0_27 = arith.constant 0 : index
    %46 = vector.load %arg7[%45, %c0_27] : memref<512x3xf32, #tpu.memory_space<vmem>>, vector<256x3xf32>
    tpu.vector_store %arg7[%45, %c0_27], %44 {strides = array<i32>} : memref<512x3xf32, #tpu.memory_space<vmem>>, vector<256x3xf32>,
    %47 = vector.extract_strided_slice %40 {offsets = [0, 6], sizes = [256, 1], strides = [1, 1]} : vector<256x8xf32> to vector<256x1xf32>
    %48 = arith.index_cast %26 : i32 to index
    %c0_28 = arith.constant 0 : index
    %49 = vector.load %arg8[%48, %c0_28] : memref<512x1xf32, #tpu.memory_space<vmem>>, vector<256x1xf32>
    tpu.vector_store %arg8[%48, %c0_28], %47 {strides = array<i32>} : memref<512x1xf32, #tpu.memory_space<vmem>>, vector<256x1xf32>,
    %c2_i32 = arith.constant 2 : i32
    return
  }
  func.func @transform_0(%arg0: i32) -> (i32, i32) {
    %c0_i32 = arith.constant 0 : i32
    %c0_i32_0 = arith.constant 0 : i32
    return %arg0, %c0_i32 : i32, i32
  }
  func.func @transform_1(%arg0: i32) -> (i32, i32) {
    %c0_i32 = arith.constant 0 : i32
    %c0_i32_0 = arith.constant 0 : i32
    %c0_i32_1 = arith.constant 0 : i32
    return %c0_i32, %c0_i32_0 : i32, i32
  }
  func.func @transform_2(%arg0: i32) -> (i32, i32) {
    %c0_i32 = arith.constant 0 : i32
    %c0_i32_0 = arith.constant 0 : i32
    %c0_i32_1 = arith.constant 0 : i32
    return %c0_i32, %c0_i32_0 : i32, i32
  }
  func.func @transform_3(%arg0: i32) -> (i32, i32) {
    %c0_i32 = arith.constant 0 : i32
    %c0_i32_0 = arith.constant 0 : i32
    %c0_i32_1 = arith.constant 0 : i32
    return %c0_i32, %c0_i32_0 : i32, i32
  }
  func.func @transform_4(%arg0: i32) -> (i32, i32) {
    %c0_i32 = arith.constant 0 : i32
    %c0_i32_0 = arith.constant 0 : i32
    %c0_i32_1 = arith.constant 0 : i32
    return %c0_i32, %c0_i32_0 : i32, i32
  }
  func.func @transform_5(%arg0: i32) -> (i32, i32) {
    %c0_i32 = arith.constant 0 : i32
    %c0_i32_0 = arith.constant 0 : i32
    return %arg0, %c0_i32 : i32, i32
  }
  func.func @transform_6(%arg0: i32) -> (i32, i32) {
    %c0_i32 = arith.constant 0 : i32
    %c0_i32_0 = arith.constant 0 : i32
    return %arg0, %c0_i32 : i32, i32
  }
  func.func @transform_7(%arg0: i32) -> (i32, i32) {
    %c0_i32 = arith.constant 0 : i32
    %c0_i32_0 = arith.constant 0 : i32
    return %arg0, %c0_i32 : i32, i32
  }
}

</mosaic_0001>

<bundles_post_ra>
// kernel: tpu_custom_call.1
= control target key start
LH: loop header
LB: loop body
LE: loop exit
PB: predicated region body
PF: predicated region fallthrough
CT: control target
= control target key end

     0   :  { %s2208_s24 = smov 0   ;;  %s3335_s0 = inlined_call_operand.vmem [shape: f32[1024,16], index: 0, kind: input, shape index: {}]   ;;  %s3336_s1 = inlined_call_operand.vmem [shape: f32[16,128], index: 1, kind: input, shape index: {}]   ;;  %s3337_s2 = inlined_call_operand.vmem [shape: f32[1,128], index: 2, kind: input, shape index: {}]   ;;  %s3338_s3 = inlined_call_operand.vmem [shape: f32[128,8], index: 3, kind: input, shape index: {}]   ;;  %s3339_s4 = inlined_call_operand.vmem [shape: f32[1,8], index: 4, kind: input, shape index: {}]   ;;  %s3340_s5 = inlined_call_operand.vmem [shape: f32[1024,3], index: 5, kind: output, shape index: {0}]   ;;  %s3341_s6 = inlined_call_operand.vmem [shape: f32[1024,3], index: 6, kind: output, shape index: {1}]   ;;  %s3342_s7 = inlined_call_operand.vmem [shape: f32[1024,1], index: 7, kind: output, shape index: {2}]  }
   0x1 LB: > { %s1904_s25 = sadd.s32 4294967295, %s2164_s24   ;;  %p1908_p0 = scmp.ge.s32.totalorder %s2164_s24, 1  ;;  %s2164_s24 = sphi %s2208_s24, %s18_s24  }
   0x2   : > { %p243_p1 = scmp.lt.s32.totalorder %s2164_s24, 3 }
   0x4   : > { %p244_p2 = pnand %p1908_p0, %p243_p1 }
   0x5   : > { %s1909_s30 = sshll.u32 (!%p244_p2), %s1904_s25, 6  ;;  %s2166_s12 = smov (!%p244_p2), 125  }
   0x6   : > { %247 = sbr.rel (%p244_p2) target bundleno = 741 (0x2e5), region = 40  ;;  %p286_p3 = scmp.lt.s32.totalorder (!%p244_p2), %s1909_s30, 127 }
   0x7   : > { %s2167_s15 = smov (!%p244_p2), 122  }
   0xb   : > { %v342_v0 = vld [vmem:[%s3336_s1 + $0x8] sm:$0xff]  ;;  %v341_v1 = vld [vmem:[%s3336_s1] sm:$0xff]  ;;  %s3344_s30 = smov (!%p286_p3, %s1909_s30), 127  ;;  %vm347_vm0 = vcmask 130048   ;;  %v604_v6 = vld [vmem:[%s3338_s3 + $0x78] sm:$0xff]  ;;  %vm722_vm1 = vcmask 23552  }
   0xc   : > { %458 = vmatpush.msra.mxu0 %v342_v0  ;;  %1193 = vmatpush.msra.mxu2 %v342_v0  ;;  %s2222_s8 = sshll.u32 %s3344_s30, 3  ;;  %v603_v11 = vld [vmem:[%s3338_s3 + $0x70] sm:$0xff]  ;;  %v602_v16 = vld [vmem:[%s3338_s3 + $0x68] sm:$0xff]  ;;  %v601_v21 = vld [vmem:[%s3338_s3 + $0x60] sm:$0xff]  ;;  %vm1011_vm2 = vcmask 7168  }
   0xd   : > { %s2228_s11 = scalar_lea.vmem %s3335_s0, %s2222_s8  ;;  %2111 = vmatpush.msra.mxu1 %v604_v6  ;;  %2127 = vmatpush.msra.mxu3 %v604_v6  ;;  %v600_v26 = vld [vmem:[%s3338_s3 + $0x58] sm:$0xff]  ;;  %v599_v29 = vld [vmem:[%s3338_s3 + $0x50] sm:$0xff]  ;;  %v598_v30 = vld [vmem:[%s3338_s3 + $0x48] sm:$0xff]  ;;  %s2466_s10 = scalar_lea.vmem %s3340_s5, %s2222_s8 }
   0xe   : > { %459 = vmatpush.msra.mxu0 %v341_v1  ;;  %1194 = vmatpush.msra.mxu2 %v341_v1  ;;  %v309_v2 = vld [vmem:[%s2228_s11] sm:$0xff]  ;;  %v310_v4 = vld [vmem:[%s2228_s11 + $0x8] sm:$0xff]  ;;  %v311_v7 = vld [vmem:[%s2228_s11 + $0x10] sm:$0xff]  ;;  %s2644_s18 = scalar_lea.vmem %s3341_s6, %s2222_s8  ;;  %s2672_s21 = scalar_lea.vmem %s3342_s7, %s2222_s8 }
   0xf   : > { %v1949_v3 = vld [vmem:[%s2228_s11 + $0x100] sm:$0xff]  ;;  %1917 = vmatmul.msk.f32.vlgmr.msra.gmra.mxu0 %vm347_vm0, %v309_v2  ;;  %v1950_v5 = vld [vmem:[%s2228_s11 + $0x108] sm:$0xff]  ;;  %v1951_v8 = vld [vmem:[%s2228_s11 + $0x110] sm:$0xff]  ;;  %2112 = vmatpush.msra.mxu1 %v603_v11 }
  0x10   : > { %1981 = vmatmul.msk.f32.vlgmr.msra.gmra.mxu2 %vm347_vm0, %v1949_v3  ;;  %609 = vmatpush.msrb.mxu0 %v604_v6  ;;  %v312_v9 = vld [vmem:[%s2228_s11 + $0x18] sm:$0xff]  ;;  %v313_v12 = vld [vmem:[%s2228_s11 + $0x20] sm:$0xff]  ;;  %v314_v14 = vld [vmem:[%s2228_s11 + $0x28] sm:$0xff] }
  0x11   : > { %1344 = vmatpush.msrb.mxu2 %v604_v6  ;;  %v1952_v10 = vld [vmem:[%s2228_s11 + $0x118] sm:$0xff]  ;;  %2128 = vmatpush.msra.mxu3 %v603_v11  ;;  %v1953_v13 = vld [vmem:[%s2228_s11 + $0x120] sm:$0xff]  ;;  %v1954_v15 = vld [vmem:[%s2228_s11 + $0x128] sm:$0xff] }
  0x12   : > { %610 = vmatpush.msrb.mxu0 %v603_v11  ;;  %2113 = vmatpush.msra.mxu1 %v602_v16  ;;  %v315_v17 = vld [vmem:[%s2228_s11 + $0x30] sm:$0xff]  ;;  %v316_v19 = vld [vmem:[%s2228_s11 + $0x38] sm:$0xff]  ;;  %v317_v22 = vld [vmem:[%s2228_s11 + $0x40] sm:$0xff] }
  0x13   : > { %1345 = vmatpush.msrb.mxu2 %v603_v11  ;;  %2129 = vmatpush.msra.mxu3 %v602_v16  ;;  %v1955_v18 = vld [vmem:[%s2228_s11 + $0x130] sm:$0xff]  ;;  %v1956_v20 = vld [vmem:[%s2228_s11 + $0x138] sm:$0xff]  ;;  %v1957_v23 = vld [vmem:[%s2228_s11 + $0x140] sm:$0xff] }
  0x14   : > { %611 = vmatpush.msrb.mxu0 %v602_v16  ;;  %2114 = vmatpush.msra.mxu1 %v601_v21  ;;  %v318_v24 = vld [vmem:[%s2228_s11 + $0x48] sm:$0xff]  ;;  %v319_v27 = vld [vmem:[%s2228_s11 + $0x50] sm:$0xff]  ;;  %v320_v31 = vld [vmem:[%s2228_s11 + $0x58] sm:$0xff] }
  0x15   : > { %1346 = vmatpush.msrb.mxu2 %v602_v16  ;;  %2130 = vmatpush.msra.mxu3 %v601_v21  ;;  %v1958_v25 = vld [vmem:[%s2228_s11 + $0x148] sm:$0xff]  ;;  %v1959_v28 = vld [vmem:[%s2228_s11 + $0x150] sm:$0xff]  ;;  %v1960_v32 = vld [vmem:[%s2228_s11 + $0x158] sm:$0xff] }
  0x16   : > { %612 = vmatpush.msrb.mxu0 %v601_v21  ;;  %2115 = vmatpush.msra.mxu1 %v600_v26  ;;  %v597_v33 = vld [vmem:[%s3338_s3 + $0x40] sm:$0xff]  ;;  %v596_v34 = vld [vmem:[%s3338_s3 + $0x38] sm:$0xff]  ;;  %v595_v35 = vld [vmem:[%s3338_s3 + $0x30] sm:$0xff] }
  0x17   : > { %1918 = vmatmul.msk.f32.gmra.mxu0 %vm347_vm0, %v310_v4  ;;  %1347 = vmatpush.msrb.mxu2 %v601_v21  ;;  %v321_v36 = vld [vmem:[%s2228_s11 + $0x60] sm:$0xff]  ;;  %v594_v38 = vld [vmem:[%s3338_s3 + $0x28] sm:$0xff]  ;;  %v592_v40 = vld [vmem:[%s3338_s3 + $0x18] sm:$0xff] }
  0x18   : > { %1982 = vmatmul.msk.f32.gmra.mxu2 %vm347_vm0, %v1950_v5  ;;  %613 = vmatpush.msrb.mxu0 %v600_v26  ;;  %v1961_v37 = vld [vmem:[%s2228_s11 + $0x160] sm:$0xff]  ;;  %v591_v41 = vld [vmem:[%s3338_s3 + $0x10] sm:$0xff]  ;;  %v322_v42 = vld [vmem:[%s2228_s11 + $0x68] sm:$0xff] }
  0x19   : > { %1348 = vmatpush.msrb.mxu2 %v600_v26  ;;  %2131 = vmatpush.msra.mxu3 %v600_v26  ;;  %v593_v39 = vld [vmem:[%s3338_s3 + $0x20] sm:$0xff]  ;;  %v1962_v43 = vld [vmem:[%s2228_s11 + $0x168] sm:$0xff]  ;;  %v323_v46 = vld [vmem:[%s2228_s11 + $0x70] sm:$0xff] }
  0x1a   : > { %2116 = vmatpush.msra.mxu1 %v599_v29  ;;  %614 = vmatpush.msrb.mxu0 %v599_v29  ;;  %v590_v44 = vld [vmem:[%s3338_s3 + $0x8] sm:$0xff]  ;;  %v589_v45 = vld [vmem:[%s3338_s3] sm:$0xff]  ;;  %v1963_v47 = vld [vmem:[%s2228_s11 + $0x170] sm:$0xff] }
  0x1b   : > { %2132 = vmatpush.msra.mxu3 %v599_v29  ;;  %1349 = vmatpush.msrb.mxu2 %v599_v29  ;;  %v324_v48 = vld [vmem:[%s2228_s11 + $0x78] sm:$0xff]  ;;  %v325_v51 = vld [vmem:[%s2228_s11 + $0x80] sm:$0xff]  ;;  %v326_v56 = vld [vmem:[%s2228_s11 + $0x88] sm:$0xff] }
  0x1c   : > { %2117 = vmatpush.msra.mxu1 %v598_v30  ;;  %615 = vmatpush.msrb.mxu0 %v598_v30  ;;  %v1964_v49 = vld [vmem:[%s2228_s11 + $0x178] sm:$0xff]  ;;  %v1965_v52 = vld [vmem:[%s2228_s11 + $0x180] sm:$0xff]  ;;  %v1966_v57 = vld [vmem:[%s2228_s11 + $0x188] sm:$0xff] }
  0x1d   : > { %2133 = vmatpush.msra.mxu3 %v598_v30  ;;  %1350 = vmatpush.msrb.mxu2 %v598_v30  ;;  %v2353_v54 = vld [vmem:[%s3337_s2] ss:$0 sm:$0xff]  ;;  %v327_v0 = vld [vmem:[%s2228_s11 + $0x90] sm:$0xff] }
  0x1e   : > { %2118 = vmatpush.msra.mxu1 %v597_v33  ;;  %616 = vmatpush.msrb.mxu0 %v597_v33  ;;  %v2363_v60 = vld [vmem:[%s3337_s2] ss:$0 sm:$0xff]  ;;  %v1967_v1 = vld [vmem:[%s2228_s11 + $0x190] sm:$0xff] }
  0x1f   : > { %1919 = vmatmul.msk.f32.gmra.mxu0 %vm347_vm0, %v311_v7  ;;  %2134 = vmatpush.msra.mxu3 %v597_v33  ;;  %v329_v16 = vld [vmem:[%s2228_s11 + $0xa0] sm:$0xff] }
  0x20   : > { %1983 = vmatmul.msk.f32.gmra.mxu2 %vm347_vm0, %v1951_v8  ;;  %2119 = vmatpush.msra.mxu1 %v596_v34  ;;  %v328_v8 = vld [vmem:[%s2228_s11 + $0x98] sm:$0xff] }
  0x21   : > { %1351 = vmatpush.msrb.mxu2 %v597_v33  ;;  %2135 = vmatpush.msra.mxu3 %v596_v34  ;;  %v1971_v33 = vld [vmem:[%s2228_s11 + $0x1b0] sm:$0xff] }
  0x22   : > { %617 = vmatpush.msrb.mxu0 %v596_v34  ;;  %2120 = vmatpush.msra.mxu1 %v595_v35 }
  0x23   : > { %1352 = vmatpush.msrb.mxu2 %v596_v34  ;;  %2136 = vmatpush.msra.mxu3 %v595_v35 }
  0x24   : > { %618 = vmatpush.msrb.mxu0 %v595_v35  ;;  %2121 = vmatpush.msra.mxu1 %v594_v38 }
  0x25   : > { %1353 = vmatpush.msrb.mxu2 %v595_v35  ;;  %2137 = vmatpush.msra.mxu3 %v594_v38 }
  0x26   : > { %2122 = vmatpush.msra.mxu1 %v593_v39  ;;  %619 = vmatpush.msrb.mxu0 %v594_v38 }
  0x27   : > { %1920 = vmatmul.msk.f32.gmra.mxu0 %vm347_vm0, %v312_v9  ;;  %2138 = vmatpush.msra.mxu3 %v593_v39  ;;  %v1968_v9 = vld [vmem:[%s2228_s11 + $0x198] sm:$0xff] }
  0x28   : > { %1984 = vmatmul.msk.f32.gmra.mxu2 %vm347_vm0, %v1952_v10  ;;  %2123 = vmatpush.msra.mxu1 %v592_v40 }
  0x29   : > { %1354 = vmatpush.msrb.mxu2 %v594_v38  ;;  %2139 = vmatpush.msra.mxu3 %v592_v40 }
  0x2a   : > { %620 = vmatpush.msrb.mxu0 %v593_v39  ;;  %2124 = vmatpush.msra.mxu1 %v591_v41 }
  0x2b   : > { %1355 = vmatpush.msrb.mxu2 %v593_v39  ;;  %2140 = vmatpush.msra.mxu3 %v591_v41 }
  0x2c   : > { %621 = vmatpush.msrb.mxu0 %v592_v40  ;;  %2125 = vmatpush.msra.mxu1 %v590_v44 }
  0x2d   : > { %1356 = vmatpush.msrb.mxu2 %v592_v40  ;;  %2141 = vmatpush.msra.mxu3 %v590_v44  ;;  %v332_v40 = vld [vmem:[%s2228_s11 + $0xb8] sm:$0xff] }
  0x2e   : > { %2126 = vmatpush.msra.mxu1 %v589_v45  ;;  %622 = vmatpush.msrb.mxu0 %v591_v41 }
  0x2f   : > { %1921 = vmatmul.msk.f32.gmra.mxu0 %vm347_vm0, %v313_v12  ;;  %2142 = vmatpush.msra.mxu3 %v589_v45 }
  0x30   : > { %1985 = vmatmul.msk.f32.gmra.mxu2 %vm347_vm0, %v1953_v13  ;;  %623 = vmatpush.msrb.mxu0 %v590_v44 }
  0x31   : > { %1357 = vmatpush.msrb.mxu2 %v591_v41  ;;  %v1972_v41 = vld [vmem:[%s2228_s11 + $0x1b8] sm:$0xff] }
  0x32   : > { %624 = vmatpush.msrb.mxu0 %v589_v45 }
  0x33   : > { %1358 = vmatpush.msrb.mxu2 %v590_v44 }
  0x35   : > { %1359 = vmatpush.msrb.mxu2 %v589_v45 }
  0x37   : > { %1922 = vmatmul.msk.f32.gmra.mxu0 %vm347_vm0, %v314_v14 }
  0x38   : > { %1986 = vmatmul.msk.f32.gmra.mxu2 %vm347_vm0, %v1954_v15 }
  0x3f   : > { %1923 = vmatmul.msk.f32.gmra.mxu0 %vm347_vm0, %v315_v17  ;;  %v1969_v17 = vld [vmem:[%s2228_s11 + $0x1a0] sm:$0xff] }
  0x40   : > { %1987 = vmatmul.msk.f32.gmra.mxu2 %vm347_vm0, %v1955_v18 }
  0x47   : > { %1924 = vmatmul.msk.f32.gmra.mxu0 %vm347_vm0, %v316_v19 }
  0x48   : > { %1988 = vmatmul.msk.f32.gmra.mxu2 %vm347_vm0, %v1956_v20 }
  0x4f   : > { %1925 = vmatmul.msk.f32.gmra.mxu0 %vm347_vm0, %v317_v22 }
  0x50   : > { %1989 = vmatmul.msk.f32.gmra.mxu2 %vm347_vm0, %v1957_v23 }
  0x57   : > { %1926 = vmatmul.msk.f32.gmra.mxu0 %vm347_vm0, %v318_v24  ;;  %v330_v24 = vld [vmem:[%s2228_s11 + $0xa8] sm:$0xff] }
  0x58   : > { %1990 = vmatmul.msk.f32.gmra.mxu2 %vm347_vm0, %v1958_v25  ;;  %v1970_v25 = vld [vmem:[%s2228_s11 + $0x1a8] sm:$0xff] }
  0x5f   : > { %1927 = vmatmul.msk.f32.gmra.mxu0 %vm347_vm0, %v319_v27 }
  0x60   : > { %1991 = vmatmul.msk.f32.gmra.mxu2 %vm347_vm0, %v1959_v28 }
  0x67   : > { %1928 = vmatmul.msk.f32.gmra.mxu0 %vm347_vm0, %v320_v31 }
  0x68   : > { %1992 = vmatmul.msk.f32.gmra.mxu2 %vm347_vm0, %v1960_v32  ;;  %v331_v32 = vld [vmem:[%s2228_s11 + $0xb0] sm:$0xff] }
  0x6f   : > { %1929 = vmatmul.msk.f32.gmra.mxu0 %vm347_vm0, %v321_v36 }
  0x70   : > { %1993 = vmatmul.msk.f32.gmra.mxu2 %vm347_vm0, %v1961_v37 }
  0x77   : > { %1930 = vmatmul.msk.f32.gmra.mxu0 %vm347_vm0, %v322_v42 }
  0x78   : > { %1994 = vmatmul.msk.f32.gmra.mxu2 %vm347_vm0, %v1962_v43 }
  0x7f   : > { %1931 = vmatmul.msk.f32.gmra.mxu0 %vm347_vm0, %v323_v46 }
  0x80   : > { %1995 = vmatmul.msk.f32.gmra.mxu2 %vm347_vm0, %v1963_v47 }
  0x87   : > { %1932 = vmatmul.msk.f32.gmra.mxu0 %vm347_vm0, %v324_v48  ;;  %v333_v48 = vld [vmem:[%s2228_s11 + $0xc0] sm:$0xff] }
  0x88   : > { %1996 = vmatmul.msk.f32.gmra.mxu2 %vm347_vm0, %v1964_v49  ;;  %v1973_v49 = vld [vmem:[%s2228_s11 + $0x1c0] sm:$0xff] }
  0x8c   : > { %v2342_v50 = vpop.f32.mrf.mxu0 }
  0x8f   : > { %1933 = vmatmul.msk.f32.gmra.mxu0 %vm347_vm0, %v325_v51 }
  0x90   : > { %1997 = vmatmul.msk.f32.gmra.mxu2 %vm347_vm0, %v1965_v52 }
  0x93   : > { %v2348_v53 = vpop.f32.mrf.mxu2 }
  0x94   : > { %v464_v55 = vpop.f32.mrf.mxu0 }
  0x95   : > { %v465_v58 = vadd.f32 %v2353_v54, %v464_v55 }
  0x97   : > { %1934 = vmatmul.msk.f32.gmra.mxu0 %vm347_vm0, %v326_v56  ;;  %v558_v59 = vmax.f32 %v465_v58, 0.0 }
  0x98   : > { %1998 = vmatmul.msk.f32.gmra.mxu2 %vm347_vm0, %v1966_v57 }
  0x99   : > { %628 = vmatmul.f32.vlgmr.msra.gmra.mxu1 %v558_v59  ;;  %v334_v59 = vld [vmem:[%s2228_s11 + $0xc8] sm:$0xff] }
  0x9b   : > { %v1199_v61 = vpop.f32.mrf.mxu2 }
  0x9c   : > { %v1200_v62 = vadd.f32 %v2363_v60, %v1199_v61  ;;  %v467_v63 = vpop.f32.mrf.mxu0  ;;  %v1974_v61 = vld [vmem:[%s2228_s11 + $0x1c8] sm:$0xff] }
  0x9d   : > { %v468_v2 = vadd.f32 %v2353_v54, %v467_v63 }
  0x9e   : > { %v1293_v3 = vmax.f32 %v1200_v62, 0.0 }
  0x9f   : > { %1935 = vmatmul.msk.f32.gmra.mxu0 %vm347_vm0, %v327_v0  ;;  %v559_v4 = vmax.f32 %v468_v2, 0.0 }
  0xa0   : > { %1999 = vmatmul.msk.f32.gmra.mxu2 %vm347_vm0, %v1967_v1  ;;  %1363 = vmatmul.f32.vlgmr.msra.gmra.mxu3 %v1293_v3 }
  0xa1   : > { %631 = vmatmul.f32.gmra.mxu1 %v559_v4  ;;  %v335_v4 = vld [vmem:[%s2228_s11 + $0xd0] sm:$0xff] }
  0xa3   : > { %v1202_v5 = vpop.f32.mrf.mxu2 }
  0xa4   : > { %v1203_v6 = vadd.f32 %v2363_v60, %v1202_v5  ;;  %v470_v7 = vpop.f32.mrf.mxu0  ;;  %v1975_v5 = vld [vmem:[%s2228_s11 + $0x1d0] sm:$0xff] }
  0xa5   : > { %v471_v10 = vadd.f32 %v2353_v54, %v470_v7 }
  0xa6   : > { %v1294_v11 = vmax.f32 %v1203_v6, 0.0 }
  0xa7   : > { %1936 = vmatmul.msk.f32.gmra.mxu0 %vm347_vm0, %v328_v8  ;;  %v560_v12 = vmax.f32 %v471_v10, 0.0 }
  0xa8   : > { %2000 = vmatmul.msk.f32.gmra.mxu2 %vm347_vm0, %v1968_v9  ;;  %1366 = vmatmul.f32.gmra.mxu3 %v1294_v11 }
  0xa9   : > { %634 = vmatmul.f32.gmra.mxu1 %v560_v12  ;;  %v336_v12 = vld [vmem:[%s2228_s11 + $0xd8] sm:$0xff] }
  0xab   : > { %v1205_v13 = vpop.f32.mrf.mxu2 }
  0xac   : > { %v1206_v14 = vadd.f32 %v2363_v60, %v1205_v13  ;;  %v473_v15 = vpop.f32.mrf.mxu0  ;;  %v1976_v13 = vld [vmem:[%s2228_s11 + $0x1d8] sm:$0xff] }
  0xad   : > { %v474_v18 = vadd.f32 %v2353_v54, %v473_v15 }
  0xae   : > { %v1295_v19 = vmax.f32 %v1206_v14, 0.0 }
  0xaf   : > { %1937 = vmatmul.msk.f32.gmra.mxu0 %vm347_vm0, %v329_v16  ;;  %v561_v20 = vmax.f32 %v474_v18, 0.0 }
  0xb0   : > { %2001 = vmatmul.msk.f32.gmra.mxu2 %vm347_vm0, %v1969_v17  ;;  %1369 = vmatmul.f32.gmra.mxu3 %v1295_v19 }
  0xb1   : > { %637 = vmatmul.f32.gmra.mxu1 %v561_v20  ;;  %v337_v20 = vld [vmem:[%s2228_s11 + $0xe0] sm:$0xff] }
  0xb3   : > { %v1208_v21 = vpop.f32.mrf.mxu2 }
  0xb4   : > { %v1209_v22 = vadd.f32 %v2363_v60, %v1208_v21  ;;  %v476_v23 = vpop.f32.mrf.mxu0  ;;  %v1977_v21 = vld [vmem:[%s2228_s11 + $0x1e0] sm:$0xff] }
  0xb5   : > { %v477_v26 = vadd.f32 %v2353_v54, %v476_v23 }
  0xb6   : > { %v1296_v27 = vmax.f32 %v1209_v22, 0.0 }
  0xb7   : > { %1938 = vmatmul.msk.f32.gmra.mxu0 %vm347_vm0, %v330_v24  ;;  %v562_v28 = vmax.f32 %v477_v26, 0.0 }
  0xb8   : > { %2002 = vmatmul.msk.f32.gmra.mxu2 %vm347_vm0, %v1970_v25  ;;  %1372 = vmatmul.f32.gmra.mxu3 %v1296_v27 }
  0xb9   : > { %640 = vmatmul.f32.gmra.mxu1 %v562_v28  ;;  %v338_v28 = vld [vmem:[%s2228_s11 + $0xe8] sm:$0xff] }
  0xbb   : > { %v1211_v29 = vpop.f32.mrf.mxu2 }
  0xbc   : > { %v1212_v30 = vadd.f32 %v2363_v60, %v1211_v29  ;;  %v479_v31 = vpop.f32.mrf.mxu0  ;;  %v1978_v29 = vld [vmem:[%s2228_s11 + $0x1e8] sm:$0xff] }
  0xbd   : > { %v480_v34 = vadd.f32 %v2353_v54, %v479_v31 }
  0xbe   : > { %v1297_v35 = vmax.f32 %v1212_v30, 0.0 }
  0xbf   : > { %1939 = vmatmul.msk.f32.gmra.mxu0 %vm347_vm0, %v331_v32  ;;  %v563_v36 = vmax.f32 %v480_v34, 0.0 }
  0xc0   : > { %2003 = vmatmul.msk.f32.gmra.mxu2 %vm347_vm0, %v1971_v33  ;;  %1375 = vmatmul.f32.gmra.mxu3 %v1297_v35 }
  0xc1   : > { %643 = vmatmul.f32.gmra.mxu1 %v563_v36  ;;  %v339_v36 = vld [vmem:[%s2228_s11 + $0xf0] sm:$0xff] }
  0xc3   : > { %v1214_v37 = vpop.f32.mrf.mxu2 }
  0xc4   : > { %v1215_v38 = vadd.f32 %v2363_v60, %v1214_v37  ;;  %v482_v39 = vpop.f32.mrf.mxu0  ;;  %v1979_v37 = vld [vmem:[%s2228_s11 + $0x1f0] sm:$0xff] }
  0xc5   : > { %v483_v42 = vadd.f32 %v2353_v54, %v482_v39 }
  0xc6   : > { %v1298_v43 = vmax.f32 %v1215_v38, 0.0 }
  0xc7   : > { %1940 = vmatmul.msk.f32.gmra.mxu0 %vm347_vm0, %v332_v40  ;;  %v564_v44 = vmax.f32 %v483_v42, 0.0 }
  0xc8   : > { %2004 = vmatmul.msk.f32.gmra.mxu2 %vm347_vm0, %v1972_v41  ;;  %1378 = vmatmul.f32.gmra.mxu3 %v1298_v43 }
  0xc9   : > { %646 = vmatmul.f32.gmra.mxu1 %v564_v44  ;;  %v340_v44 = vld [vmem:[%s2228_s11 + $0xf8] sm:$0xff] }
  0xcb   : > { %v1217_v45 = vpop.f32.mrf.mxu2 }
  0xcc   : > { %v1218_v46 = vadd.f32 %v2363_v60, %v1217_v45  ;;  %v485_v47 = vpop.f32.mrf.mxu0  ;;  %v1980_v45 = vld [vmem:[%s2228_s11 + $0x1f8] sm:$0xff] }
  0xcd   : > { %v486_v51 = vadd.f32 %v2353_v54, %v485_v47 }
  0xce   : > { %v1299_v52 = vmax.f32 %v1218_v46, 0.0 }
  0xcf   : > { %1941 = vmatmul.msk.f32.gmra.mxu0 %vm347_vm0, %v333_v48  ;;  %v565_v55 = vmax.f32 %v486_v51, 0.0  ;;  %v1197_v51 = vadd.f32 %v2363_v60, %v2348_v53  ;;  %v2459_v53 = vld [vmem:[%s3339_s4] ss:$0 sm:$0xff] }
  0xd0   : > { %2005 = vmatmul.msk.f32.gmra.mxu2 %vm347_vm0, %v1973_v49  ;;  %1381 = vmatmul.f32.gmra.mxu3 %v1299_v52  ;;  %v462_v49 = vadd.f32 %v2353_v54, %v2342_v50 }
  0xd1   : > { %649 = vmatmul.f32.gmra.mxu1 %v565_v55 }
  0xd3   : > { %v1220_v56 = vpop.f32.mrf.mxu2 }
  0xd4   : > { %v1221_v57 = vadd.f32 %v2363_v60, %v1220_v56  ;;  %v488_v58 = vpop.f32.mrf.mxu0 }
  0xd5   : > { %v489_v62 = vadd.f32 %v2353_v54, %v488_v58  ;;  %v1292_v58 = vmax.f32 %v1197_v51, 0.0 }
  0xd6   : > { %v1300_v63 = vmax.f32 %v1221_v57, 0.0  ;;  %v557_v57 = vmax.f32 %v462_v49, 0.0 }
  0xd7   : > { %v566_v0 = vmax.f32 %v489_v62, 0.0  ;;  %1942 = vmatmul.msk.f32.gmra.mxu0 %vm347_vm0, %v334_v59 }
  0xd8   : > { %2006 = vmatmul.msk.f32.gmra.mxu2 %vm347_vm0, %v1974_v61  ;;  %1384 = vmatmul.f32.gmra.mxu3 %v1300_v63 }
  0xd9   : > { %652 = vmatmul.f32.gmra.mxu1 %v566_v0 }
  0xdb   : > { %v1223_v1 = vpop.f32.mrf.mxu2 }
  0xdc   : > { %v1224_v2 = vadd.f32 %v2363_v60, %v1223_v1  ;;  %v491_v3 = vpop.f32.mrf.mxu0 }
  0xdd   : > { %v492_v7 = vadd.f32 %v2353_v54, %v491_v3 }
  0xde   : > { %v1301_v6 = vmax.f32 %v1224_v2, 0.0 }
  0xdf   : > { %v567_v8 = vmax.f32 %v492_v7, 0.0  ;;  %1943 = vmatmul.msk.f32.gmra.mxu0 %vm347_vm0, %v335_v4 }
  0xe0   : > { %2007 = vmatmul.msk.f32.gmra.mxu2 %vm347_vm0, %v1975_v5  ;;  %1387 = vmatmul.f32.gmra.mxu3 %v1301_v6 }
  0xe1   : > { %655 = vmatmul.f32.gmra.mxu1 %v567_v8 }
  0xe3   : > { %v1226_v9 = vpop.f32.mrf.mxu2 }
  0xe4   : > { %v1227_v10 = vadd.f32 %v2363_v60, %v1226_v9  ;;  %v494_v11 = vpop.f32.mrf.mxu0 }
  0xe5   : > { %v495_v15 = vadd.f32 %v2353_v54, %v494_v11 }
  0xe6   : > { %v1302_v14 = vmax.f32 %v1227_v10, 0.0 }
  0xe7   : > { %v568_v16 = vmax.f32 %v495_v15, 0.0  ;;  %1944 = vmatmul.msk.f32.gmra.mxu0 %vm347_vm0, %v336_v12 }
  0xe8   : > { %2008 = vmatmul.msk.f32.gmra.mxu2 %vm347_vm0, %v1976_v13  ;;  %1390 = vmatmul.f32.gmra.mxu3 %v1302_v14  ;;  %v2478_v14 = vld [vmem:[%s3339_s4] ss:$0 sm:$0xff] }
  0xe9   : > { %658 = vmatmul.f32.gmra.mxu1 %v568_v16 }
  0xeb   : > { %v1229_v17 = vpop.f32.mrf.mxu2 }
  0xec   : > { %v1230_v18 = vadd.f32 %v2363_v60, %v1229_v17  ;;  %v497_v19 = vpop.f32.mrf.mxu0 }
  0xed   : > { %v498_v23 = vadd.f32 %v2353_v54, %v497_v19 }
  0xee   : > { %v1303_v22 = vmax.f32 %v1230_v18, 0.0 }
  0xef   : > { %v569_v24 = vmax.f32 %v498_v23, 0.0  ;;  %1945 = vmatmul.msk.f32.gmra.mxu0 %vm347_vm0, %v337_v20 }
  0xf0   : > { %2009 = vmatmul.msk.f32.gmra.mxu2 %vm347_vm0, %v1977_v21  ;;  %1393 = vmatmul.f32.gmra.mxu3 %v1303_v22 }
  0xf1   : > { %661 = vmatmul.f32.gmra.mxu1 %v569_v24 }
  0xf3   : > { %v1232_v25 = vpop.f32.mrf.mxu2 }
  0xf4   : > { %v1233_v26 = vadd.f32 %v2363_v60, %v1232_v25  ;;  %v500_v27 = vpop.f32.mrf.mxu0 }
  0xf5   : > { %v501_v31 = vadd.f32 %v2353_v54, %v500_v27 }
  0xf6   : > { %v1304_v30 = vmax.f32 %v1233_v26, 0.0 }
  0xf7   : > { %v570_v32 = vmax.f32 %v501_v31, 0.0  ;;  %1946 = vmatmul.msk.f32.gmra.mxu0 %vm347_vm0, %v338_v28 }
  0xf8   : > { %2010 = vmatmul.msk.f32.gmra.mxu2 %vm347_vm0, %v1978_v29  ;;  %1396 = vmatmul.f32.gmra.mxu3 %v1304_v30 }
  0xf9   : > { %664 = vmatmul.f32.gmra.mxu1 %v570_v32 }
  0xfb   : > { %v1235_v33 = vpop.f32.mrf.mxu2 }
  0xfc   : > { %v1236_v34 = vadd.f32 %v2363_v60, %v1235_v33  ;;  %v503_v35 = vpop.f32.mrf.mxu0 }
  0xfd   : > { %v504_v39 = vadd.f32 %v2353_v54, %v503_v35 }
  0xfe   : > { %v1305_v38 = vmax.f32 %v1236_v34, 0.0 }
  0xff   : > { %v571_v40 = vmax.f32 %v504_v39, 0.0  ;;  %1947 = vmatmul.msk.f32.gmra.mxu0 %vm347_vm0, %v339_v36 }
 0x100   : > { %2011 = vmatmul.msk.f32.gmra.mxu2 %vm347_vm0, %v1979_v37  ;;  %1399 = vmatmul.f32.gmra.mxu3 %v1305_v38 }
 0x101   : > { %667 = vmatmul.f32.gmra.mxu1 %v571_v40 }
 0x103   : > { %v1238_v41 = vpop.f32.mrf.mxu2 }
 0x104   : > { %v1239_v42 = vadd.f32 %v2363_v60, %v1238_v41  ;;  %v506_v43 = vpop.f32.mrf.mxu0 }
 0x105   : > { %v507_v47 = vadd.f32 %v2353_v54, %v506_v43 }
 0x106   : > { %v1306_v46 = vmax.f32 %v1239_v42, 0.0 }
 0x107   : > { %v572_v48 = vmax.f32 %v507_v47, 0.0  ;;  %1948 = vmatmul.msk.f32.gmra.mxu0 %vm347_vm0, %v340_v44 }
 0x108   : > { %2012 = vmatmul.msk.f32.gmra.mxu2 %vm347_vm0, %v1980_v45  ;;  %1402 = vmatmul.f32.gmra.mxu3 %v1306_v46 }
 0x109   : > { %670 = vmatmul.f32.gmra.mxu1 %v572_v48 }
 0x10b   : > { %v1241_v52 = vpop.f32.mrf.mxu2 }
 0x10c   : > { %v1242_v55 = vadd.f32 %v2363_v60, %v1241_v52  ;;  %v509_v56 = vpop.f32.mrf.mxu0 }
 0x10d   : > { %v510_v61 = vadd.f32 %v2353_v54, %v509_v56 }
 0x10e   : > { %v1307_v59 = vmax.f32 %v1242_v55, 0.0 }
 0x10f   : > { %v573_v62 = vmax.f32 %v510_v61, 0.0  ;;  %625 = vmatmul.f32.vlgmr.msrb.gmra.mxu0 %v557_v57 }
 0x110   : > { %1360 = vmatmul.f32.vlgmr.msrb.gmra.mxu2 %v1292_v58  ;;  %1405 = vmatmul.f32.gmra.mxu3 %v1307_v59 }
 0x111   : > { %673 = vmatmul.f32.gmra.mxu1 %v573_v62 }
 0x113   : > { %v1244_v50 = vpop.f32.mrf.mxu2 }
 0x114   : > { %v1245_v63 = vadd.f32 %v2363_v60, %v1244_v50  ;;  %v512_v0 = vpop.f32.mrf.mxu0 }
 0x115   : > { %v513_v2 = vadd.f32 %v2353_v54, %v512_v0 }
 0x116   : > { %v1308_v1 = vmax.f32 %v1245_v63, 0.0  ;;  %v629_v3 = vpop.f32.mrf.mxu1 }
 0x117   : > { %v574_v4 = vmax.f32 %v513_v2, 0.0  ;;  %v630_v5 = vadd.f32 %v2459_v53, %v629_v3 }
 0x118   : > { %1408 = vmatmul.f32.gmra.mxu3 %v1308_v1 }
 0x119   : > { %724 = vst.msk [vmem:[%s2466_s10 + $0x8] sm:$0xff] %vm722_vm1, %v630_v5  ;;  %789 = vrot.lane.b32.xlu0 %v630_v5, %s2166_s12  ;;  %676 = vmatmul.f32.gmra.mxu1 %v574_v4 }
 0x11b   : > { %v1247_v6 = vpop.f32.mrf.mxu2 }
 0x11c   : > { %v1248_v7 = vadd.f32 %v2363_v60, %v1247_v6  ;;  %v515_v8 = vpop.f32.mrf.mxu0 }
 0x11d   : > { %v516_v10 = vadd.f32 %v2353_v54, %v515_v8 }
 0x11e   : > { %v1309_v9 = vmax.f32 %v1248_v7, 0.0  ;;  %v632_v11 = vpop.f32.mrf.mxu1 }
 0x11f   : > { %v575_v12 = vmax.f32 %v516_v10, 0.0  ;;  %v633_v13 = vadd.f32 %v2459_v53, %v632_v11 }
 0x120   : > { %1411 = vmatmul.f32.gmra.mxu3 %v1309_v9 }
 0x121   : > { %725 = vst.msk [vmem:[%s2466_s10 + $0x10] sm:$0xff] %vm722_vm1, %v633_v13  ;;  %791 = vrot.lane.b32.xlu1 %v633_v13, %s2166_s12  ;;  %917 = vrot.lane.b32.xlu0 %v630_v5, %s2167_s15 }
 0x122   : > { %679 = vmatmul.f32.gmra.mxu1 %v575_v12 }
 0x123   : > { %v1250_v15 = vpop.f32.mrf.mxu2  ;;  %v1364_v17 = vpop.f32.mrf.mxu3 }
 0x124   : > { %v1251_v16 = vadd.f32 %v2363_v60, %v1250_v15  ;;  %v1365_v18 = vadd.f32 %v2478_v14, %v1364_v17  ;;  %v518_v19 = vpop.f32.mrf.mxu0 }
 0x125   : > { %v519_v21 = vadd.f32 %v2353_v54, %v518_v19 }
 0x126   : > { %v1310_v20 = vmax.f32 %v1251_v16, 0.0  ;;  %2014 = vst.msk [vmem:[%s2466_s10 + $0x108] sm:$0xff] %vm722_vm1, %v1365_v18  ;;  %1524 = vrot.lane.b32.xlu2 %v1365_v18, %s2166_s12  ;;  %v635_v22 = vpop.f32.mrf.mxu1 }
 0x127   : > { %v576_v23 = vmax.f32 %v519_v21, 0.0  ;;  %v636_v24 = vadd.f32 %v2459_v53, %v635_v22 }
 0x128   : > { %1414 = vmatmul.f32.gmra.mxu3 %v1310_v20 }
 0x129   : > { %919 = vrot.lane.b32.xlu1 %v633_v13, %s2167_s15  ;;  %726 = vst.msk [vmem:[%s2466_s10 + $0x18] sm:$0xff] %vm722_vm1, %v636_v24 }
 0x12a   : > { %682 = vmatmul.f32.gmra.mxu1 %v576_v23 }
 0x12b   : > { %v1253_v25 = vpop.f32.mrf.mxu2  ;;  %v1367_v27 = vpop.f32.mrf.mxu3 }
 0x12c   : > { %v1254_v26 = vadd.f32 %v2363_v60, %v1253_v25  ;;  %v1368_v28 = vadd.f32 %v2478_v14, %v1367_v27  ;;  %v521_v29 = vpop.f32.mrf.mxu0 }
 0x12d   : > { %v522_v31 = vadd.f32 %v2353_v54, %v521_v29 }
 0x12e   : > { %v1311_v30 = vmax.f32 %v1254_v26, 0.0  ;;  %2015 = vst.msk [vmem:[%s2466_s10 + $0x110] sm:$0xff] %vm722_vm1, %v1368_v28  ;;  %921 = vrot.lane.b32.xlu2 %v636_v24, %s2167_s15  ;;  %1526 = vrot.lane.b32.xlu0 %v1368_v28, %s2166_s12  ;;  %v638_v32 = vpop.f32.mrf.mxu1 }
 0x12f   : > { %v577_v33 = vmax.f32 %v522_v31, 0.0  ;;  %v639_v34 = vadd.f32 %v2459_v53, %v638_v32 }
 0x130   : > { %1417 = vmatmul.f32.gmra.mxu3 %v1311_v30 }
 0x131   : > { %1653 = vrot.lane.b32.xlu1 %v1365_v18, %s2167_s15  ;;  %727 = vst.msk [vmem:[%s2466_s10 + $0x20] sm:$0xff] %vm722_vm1, %v639_v34 }
 0x132   : > { %685 = vmatmul.f32.gmra.mxu1 %v577_v33 }
 0x133   : > { %v1256_v35 = vpop.f32.mrf.mxu2  ;;  %v1370_v37 = vpop.f32.mrf.mxu3 }
 0x134   : > { %v1257_v36 = vadd.f32 %v2363_v60, %v1256_v35  ;;  %v524_v38 = vpop.f32.mrf.mxu0  ;;  %v1371_v39 = vadd.f32 %v2478_v14, %v1370_v37 }
 0x135   : > { %v525_v41 = vadd.f32 %v2353_v54, %v524_v38 }
 0x136   : > { %v1312_v40 = vmax.f32 %v1257_v36, 0.0  ;;  %1655 = vrot.lane.b32.xlu2 %v1368_v28, %s2167_s15  ;;  %923 = vrot.lane.b32.xlu0 %v639_v34, %s2167_s15  ;;  %v641_v42 = vpop.f32.mrf.mxu1  ;;  %2016 = vst.msk [vmem:[%s2466_s10 + $0x118] sm:$0xff] %vm722_vm1, %v1371_v39 }
 0x137   : > { %v578_v43 = vmax.f32 %v525_v41, 0.0  ;;  %v642_v44 = vadd.f32 %v2459_v53, %v641_v42 }
 0x138   : > { %1420 = vmatmul.f32.gmra.mxu3 %v1312_v40 }
 0x139   : > { %793 = vrot.lane.b32.xlu1 %v636_v24, %s2166_s12  ;;  %728 = vst.msk [vmem:[%s2466_s10 + $0x28] sm:$0xff] %vm722_vm1, %v642_v44 }
 0x13a   : > { %688 = vmatmul.f32.gmra.mxu1 %v578_v43 }
 0x13b   : > { %v1259_v45 = vpop.f32.mrf.mxu2  ;;  %v1373_v47 = vpop.f32.mrf.mxu3 }
 0x13c   : > { %v1260_v46 = vadd.f32 %v2363_v60, %v1259_v45  ;;  %v527_v48 = vpop.f32.mrf.mxu0  ;;  %v1374_v49 = vadd.f32 %v2478_v14, %v1373_v47 }
 0x13d   : > { %v528_v52 = vadd.f32 %v2353_v54, %v527_v48 }
 0x13e   : > { %v1313_v51 = vmax.f32 %v1260_v46, 0.0  ;;  %795 = vrot.lane.b32.xlu2 %v639_v34, %s2166_s12  ;;  %1657 = vrot.lane.b32.xlu0 %v1371_v39, %s2167_s15  ;;  %v644_v55 = vpop.f32.mrf.mxu1  ;;  %2017 = vst.msk [vmem:[%s2466_s10 + $0x120] sm:$0xff] %vm722_vm1, %v1374_v49 }
 0x13f   : > { %v579_v56 = vmax.f32 %v528_v52, 0.0  ;;  %v645_v57 = vadd.f32 %v2459_v53, %v644_v55 }
 0x140   : > { %1423 = vmatmul.f32.gmra.mxu3 %v1313_v51 }
 0x141   : > { %1528 = vrot.lane.b32.xlu1 %v1371_v39, %s2166_s12  ;;  %729 = vst.msk [vmem:[%s2466_s10 + $0x30] sm:$0xff] %vm722_vm1, %v645_v57 }
 0x142   : > { %691 = vmatmul.f32.gmra.mxu1 %v579_v56 }
 0x143   : > { %v1262_v58 = vpop.f32.mrf.mxu2  ;;  %v1376_v61 = vpop.f32.mrf.mxu3 }
 0x144   : > { %v1263_v59 = vadd.f32 %v2363_v60, %v1262_v58  ;;  %v530_v62 = vpop.f32.mrf.mxu0  ;;  %v1377_v50 = vadd.f32 %v2478_v14, %v1376_v61 }
 0x145   : > { %v531_v0 = vadd.f32 %v2353_v54, %v530_v62 }
 0x146   : > { %v1314_v63 = vmax.f32 %v1263_v59, 0.0  ;;  %797 = vrot.lane.b32.xlu2 %v642_v44, %s2166_s12  ;;  %799 = vrot.lane.b32.xlu0 %v645_v57, %s2166_s12  ;;  %2018 = vst.msk [vmem:[%s2466_s10 + $0x128] sm:$0xff] %vm722_vm1, %v1377_v50  ;;  %v647_v1 = vpop.f32.mrf.mxu1 }
 0x147   : > { %v580_v2 = vmax.f32 %v531_v0, 0.0  ;;  %v648_v3 = vadd.f32 %v2459_v53, %v647_v1 }
 0x148   : > { %1426 = vmatmul.f32.gmra.mxu3 %v1314_v63 }
 0x149   : > { %925 = vrot.lane.b32.xlu1 %v642_v44, %s2167_s15  ;;  %730 = vst.msk [vmem:[%s2466_s10 + $0x38] sm:$0xff] %vm722_vm1, %v648_v3 }
 0x14a   : > { %694 = vmatmul.f32.gmra.mxu1 %v580_v2 }
 0x14b   : > { %v1265_v4 = vpop.f32.mrf.mxu2  ;;  %v1379_v6 = vpop.f32.mrf.mxu3 }
 0x14c   : > { %v1266_v5 = vadd.f32 %v2363_v60, %v1265_v4  ;;  %v533_v7 = vpop.f32.mrf.mxu0  ;;  %v1380_v8 = vadd.f32 %v2478_v14, %v1379_v6 }
 0x14d   : > { %v534_v10 = vadd.f32 %v2353_v54, %v533_v7 }
 0x14e   : > { %v1315_v9 = vmax.f32 %v1266_v5, 0.0  ;;  %1530 = vrot.lane.b32.xlu2 %v1374_v49, %s2166_s12  ;;  %1532 = vrot.lane.b32.xlu0 %v1377_v50, %s2166_s12  ;;  %v650_v11 = vpop.f32.mrf.mxu1  ;;  %2019 = vst.msk [vmem:[%s2466_s10 + $0x130] sm:$0xff] %vm722_vm1, %v1380_v8 }
 0x14f   : > { %v581_v12 = vmax.f32 %v534_v10, 0.0  ;;  %v651_v13 = vadd.f32 %v2459_v53, %v650_v11 }
 0x150   : > { %1429 = vmatmul.f32.gmra.mxu3 %v1315_v9 }
 0x151   : > { %1659 = vrot.lane.b32.xlu1 %v1374_v49, %s2167_s15  ;;  %731 = vst.msk [vmem:[%s2466_s10 + $0x40] sm:$0xff] %vm722_vm1, %v651_v13 }
 0x152   : > { %697 = vmatmul.f32.gmra.mxu1 %v581_v12 }
 0x153   : > { %v1268_v15 = vpop.f32.mrf.mxu2  ;;  %v1382_v17 = vpop.f32.mrf.mxu3 }
 0x154   : > { %v1269_v16 = vadd.f32 %v2363_v60, %v1268_v15  ;;  %v536_v18 = vpop.f32.mrf.mxu0  ;;  %v1383_v19 = vadd.f32 %v2478_v14, %v1382_v17 }
 0x155   : > { %v537_v21 = vadd.f32 %v2353_v54, %v536_v18 }
 0x156   : > { %v1316_v20 = vmax.f32 %v1269_v16, 0.0  ;;  %927 = vrot.lane.b32.xlu2 %v645_v57, %s2167_s15  ;;  %929 = vrot.lane.b32.xlu0 %v648_v3, %s2167_s15  ;;  %v653_v22 = vpop.f32.mrf.mxu1  ;;  %2020 = vst.msk [vmem:[%s2466_s10 + $0x138] sm:$0xff] %vm722_vm1, %v1383_v19 }
 0x157   : > { %v582_v23 = vmax.f32 %v537_v21, 0.0  ;;  %v2557_v24 = vadd.f32 %v2459_v53, %v653_v22 }
 0x158   : > { %1432 = vmatmul.f32.gmra.mxu3 %v1316_v20 }
 0x159   : > { %801 = vrot.lane.b32.xlu1 %v648_v3, %s2166_s12  ;;  %732 = vst.msk [vmem:[%s2466_s10 + $0x48] sm:$0xff] %vm722_vm1, %v2557_v24 }
 0x15a   : > { %700 = vmatmul.f32.gmra.mxu1 %v582_v23 }
 0x15b   : > { %v1271_v25 = vpop.f32.mrf.mxu2  ;;  %v1385_v27 = vpop.f32.mrf.mxu3 }
 0x15c   : > { %v1272_v26 = vadd.f32 %v2363_v60, %v1271_v25  ;;  %v539_v28 = vpop.f32.mrf.mxu0  ;;  %v2565_v29 = vadd.f32 %v2478_v14, %v1385_v27 }
 0x15d   : > { %v540_v31 = vadd.f32 %v2353_v54, %v539_v28 }
 0x15e   : > { %v1317_v30 = vmax.f32 %v1272_v26, 0.0  ;;  %1661 = vrot.lane.b32.xlu2 %v1377_v50, %s2167_s15  ;;  %1663 = vrot.lane.b32.xlu0 %v1380_v8, %s2167_s15  ;;  %2021 = vst.msk [vmem:[%s2466_s10 + $0x140] sm:$0xff] %vm722_vm1, %v2565_v29  ;;  %v656_v32 = vpop.f32.mrf.mxu1 }
 0x15f   : > { %v583_v33 = vmax.f32 %v540_v31, 0.0  ;;  %v657_v34 = vadd.f32 %v2459_v53, %v656_v32 }
 0x160   : > { %1435 = vmatmul.f32.gmra.mxu3 %v1317_v30 }
 0x161   : > { %1534 = vrot.lane.b32.xlu1 %v1380_v8, %s2166_s12  ;;  %733 = vst.msk [vmem:[%s2466_s10 + $0x50] sm:$0xff] %vm722_vm1, %v657_v34 }
 0x162   : > { %703 = vmatmul.f32.gmra.mxu1 %v583_v33 }
 0x163   : > { %v1274_v35 = vpop.f32.mrf.mxu2  ;;  %v1388_v37 = vpop.f32.mrf.mxu3 }
 0x164   : > { %v1275_v36 = vadd.f32 %v2363_v60, %v1274_v35  ;;  %v542_v38 = vpop.f32.mrf.mxu0  ;;  %v2579_v39 = vadd.f32 %v2478_v14, %v1388_v37 }
 0x165   : > { %v543_v41 = vadd.f32 %v2353_v54, %v542_v38 }
 0x166   : > { %v1318_v40 = vmax.f32 %v1275_v36, 0.0  ;;  %803 = vrot.lane.b32.xlu2 %v651_v13, %s2166_s12  ;;  %805 = vrot.lane.b32.xlu0 %v2557_v24, %s2166_s12  ;;  %v659_v42 = vpop.f32.mrf.mxu1  ;;  %2022 = vst.msk [vmem:[%s2466_s10 + $0x148] sm:$0xff] %vm722_vm1, %v2579_v39 }
 0x167   : > { %v584_v43 = vmax.f32 %v543_v41, 0.0  ;;  %v2589_v44 = vadd.f32 %v2459_v53, %v659_v42 }
 0x168   : > { %1438 = vmatmul.f32.gmra.mxu3 %v1318_v40 }
 0x169   : > { %931 = vrot.lane.b32.xlu1 %v651_v13, %s2167_s15  ;;  %734 = vst.msk [vmem:[%s2466_s10 + $0x58] sm:$0xff] %vm722_vm1, %v2589_v44 }
 0x16a   : > { %706 = vmatmul.f32.gmra.mxu1 %v584_v43 }
 0x16b   : > { %v1277_v45 = vpop.f32.mrf.mxu2  ;;  %v1391_v47 = vpop.f32.mrf.mxu3 }
 0x16c   : > { %v1278_v46 = vadd.f32 %v2363_v60, %v1277_v45  ;;  %v545_v48 = vpop.f32.mrf.mxu0  ;;  %v2597_v49 = vadd.f32 %v2478_v14, %v1391_v47 }
 0x16d   : > { %v546_v52 = vadd.f32 %v2353_v54, %v545_v48 }
 0x16e   : > { %v1319_v51 = vmax.f32 %v1278_v46, 0.0  ;;  %1536 = vrot.lane.b32.xlu2 %v1383_v19, %s2166_s12  ;;  %1538 = vrot.lane.b32.xlu0 %v2565_v29, %s2166_s12  ;;  %v662_v55 = vpop.f32.mrf.mxu1  ;;  %2023 = vst.msk [vmem:[%s2466_s10 + $0x150] sm:$0xff] %vm722_vm1, %v2597_v49 }
 0x16f   : > { %v585_v56 = vmax.f32 %v546_v52, 0.0  ;;  %v2607_v57 = vadd.f32 %v2459_v53, %v662_v55 }
 0x170   : > { %1441 = vmatmul.f32.gmra.mxu3 %v1319_v51 }
 0x171   : > { %1665 = vrot.lane.b32.xlu1 %v1383_v19, %s2167_s15  ;;  %735 = vst.msk [vmem:[%s2466_s10 + $0x60] sm:$0xff] %vm722_vm1, %v2607_v57 }
 0x172   : > { %709 = vmatmul.f32.gmra.mxu1 %v585_v56 }
 0x173   : > { %v1280_v58 = vpop.f32.mrf.mxu2  ;;  %v1394_v61 = vpop.f32.mrf.mxu3 }
 0x174   : > { %v1281_v59 = vadd.f32 %v2363_v60, %v1280_v58  ;;  %v548_v62 = vpop.f32.mrf.mxu0  ;;  %v2615_v50 = vadd.f32 %v2478_v14, %v1394_v61 }
 0x175   : > { %v549_v0 = vadd.f32 %v2353_v54, %v548_v62 }
 0x176   : > { %v1320_v63 = vmax.f32 %v1281_v59, 0.0  ;;  %933 = vrot.lane.b32.xlu2 %v2557_v24, %s2167_s15  ;;  %935 = vrot.lane.b32.xlu0 %v657_v34, %s2167_s15  ;;  %2024 = vst.msk [vmem:[%s2466_s10 + $0x158] sm:$0xff] %vm722_vm1, %v2615_v50  ;;  %v665_v1 = vpop.f32.mrf.mxu1 }
 0x177   : > { %v586_v2 = vmax.f32 %v549_v0, 0.0  ;;  %v2625_v3 = vadd.f32 %v2459_v53, %v665_v1 }
 0x178   : > { %1444 = vmatmul.f32.gmra.mxu3 %v1320_v63 }
 0x179   : > { %807 = vrot.lane.b32.xlu1 %v657_v34, %s2166_s12  ;;  %736 = vst.msk [vmem:[%s2466_s10 + $0x68] sm:$0xff] %vm722_vm1, %v2625_v3 }
 0x17a   : > { %712 = vmatmul.f32.gmra.mxu1 %v586_v2 }
 0x17b   : > { %v1283_v4 = vpop.f32.mrf.mxu2  ;;  %v1397_v6 = vpop.f32.mrf.mxu3 }
 0x17c   : > { %v1284_v5 = vadd.f32 %v2363_v60, %v1283_v4  ;;  %v551_v7 = vpop.f32.mrf.mxu0  ;;  %v2633_v8 = vadd.f32 %v2478_v14, %v1397_v6 }
 0x17d   : > { %v552_v10 = vadd.f32 %v2353_v54, %v551_v7 }
 0x17e   : > { %v1321_v9 = vmax.f32 %v1284_v5, 0.0  ;;  %1667 = vrot.lane.b32.xlu2 %v2565_v29, %s2167_s15  ;;  %1669 = vrot.lane.b32.xlu0 %v2579_v39, %s2167_s15  ;;  %v668_v11 = vpop.f32.mrf.mxu1  ;;  %2025 = vst.msk [vmem:[%s2466_s10 + $0x160] sm:$0xff] %vm722_vm1, %v2633_v8 }
 0x17f   : > { %v587_v12 = vmax.f32 %v552_v10, 0.0  ;;  %v2650_v13 = vadd.f32 %v2459_v53, %v668_v11 }
 0x180   : > { %v1525_v15 = vpop.permute.xlu2 %1524  ;;  %1447 = vmatmul.f32.gmra.mxu3 %v1321_v9 }
 0x181   : > { %2046 = vst.msk [vmem:[%s2644_s18 + $0x108] sm:$0xff] %vm722_vm1, %v1525_v15  ;;  %1540 = vrot.lane.b32.xlu1 %v2579_v39, %s2166_s12 }
 0x182   : > { %737 = vst.msk [vmem:[%s2466_s10 + $0x70] sm:$0xff] %vm722_vm1, %v2650_v13  ;;  %715 = vmatmul.f32.gmra.mxu1 %v587_v12 }
 0x183   : > { %v1286_v16 = vpop.f32.mrf.mxu2  ;;  %v1400_v18 = vpop.f32.mrf.mxu3 }
 0x184   : > { %v1287_v17 = vadd.f32 %v2363_v60, %v1286_v16  ;;  %v554_v19 = vpop.f32.mrf.mxu0  ;;  %v2661_v20 = vadd.f32 %v2478_v14, %v1400_v18 }
 0x185   : > { %v555_v22 = vadd.f32 %v2353_v54, %v554_v19 }
 0x186   : > { %v1322_v21 = vmax.f32 %v1287_v17, 0.0  ;;  %809 = vrot.lane.b32.xlu2 %v2589_v44, %s2166_s12  ;;  %811 = vrot.lane.b32.xlu0 %v2607_v57, %s2166_s12  ;;  %v671_v23 = vpop.f32.mrf.mxu1  ;;  %2026 = vst.msk [vmem:[%s2466_s10 + $0x168] sm:$0xff] %vm722_vm1, %v2661_v20 }
 0x187   : > { %v588_v24 = vmax.f32 %v555_v22, 0.0  ;;  %v2678_v25 = vadd.f32 %v2459_v53, %v671_v23 }
 0x188   : > { %v922_v54 = vpop.permute.xlu2 %921  ;;  %1450 = vmatmul.f32.gmra.mxu3 %v1322_v21 }
 0x189   : > { %1015 = vst.msk [vmem:[%s2672_s21 + $0x18] sm:$0xff] %vm1011_vm2, %v922_v54  ;;  %937 = vrot.lane.b32.xlu1 %v2589_v44, %s2167_s15 }
 0x18a   : > { %738 = vst.msk [vmem:[%s2466_s10 + $0x78] sm:$0xff] %vm722_vm1, %v2678_v25  ;;  %718 = vmatmul.f32.gmra.mxu1 %v588_v24 }
 0x18b   : > { %v1289_v26 = vpop.f32.mrf.mxu2  ;;  %v790_v28 = vpop.permute.xlu0 %789 }
 0x18c   : > { %v1290_v27 = vadd.f32 %v2363_v60, %v1289_v26  ;;  %v1403_v29 = vpop.f32.mrf.mxu3  ;;  %884 = vst.msk [vmem:[%s2644_s18 + $0x8] sm:$0xff] %vm722_vm1, %v790_v28  ;;  %v626_v30 = vpop.f32.mrf.mxu0 }
 0x18d   : > { %v2691_v31 = vadd.f32 %v2478_v14, %v1403_v29  ;;  %v2694_v33 = vadd.f32 %v2459_v53, %v626_v30 }
 0x18e   : > { %v1323_v32 = vmax.f32 %v1290_v27, 0.0  ;;  %1542 = vrot.lane.b32.xlu2 %v2597_v49, %s2166_s12  ;;  %1544 = vrot.lane.b32.xlu0 %v2615_v50, %s2166_s12  ;;  %v674_v38 = vpop.f32.mrf.mxu1 }
 0x18f   : > { %2027 = vst.msk [vmem:[%s2466_s10 + $0x170] sm:$0xff] %vm722_vm1, %v2691_v31  ;;  %v2725_v39 = vadd.f32 %v2459_v53, %v674_v38 }
 0x190   : > { %723 = vst.msk [vmem:[%s2466_s10] sm:$0xff] %vm722_vm1, %v2694_v33  ;;  %v1656_v60 = vpop.permute.xlu2 %1655  ;;  %1453 = vmatmul.f32.gmra.mxu3 %v1323_v32 }
 0x191   : > { %2079 = vst.msk [vmem:[%s2672_s21 + $0x110] sm:$0xff] %vm1011_vm2, %v1656_v60  ;;  %1671 = vrot.lane.b32.xlu1 %v2597_v49, %s2167_s15 }
 0x192   : > { %739 = vst.msk [vmem:[%s2466_s10 + $0x80] sm:$0xff] %vm722_vm1, %v2725_v39 }
 0x193   : > { %v1361_v34 = vpop.f32.mrf.mxu2  ;;  %v792_v36 = vpop.permute.xlu1 %791 }
 0x194   : > { %v2711_v35 = vadd.f32 %v2478_v14, %v1361_v34  ;;  %v918_v37 = vpop.permute.xlu0 %917  ;;  %885 = vst.msk [vmem:[%s2644_s18 + $0x10] sm:$0xff] %vm722_vm1, %v792_v36  ;;  %v1406_v42 = vpop.f32.mrf.mxu3 }
 0x195   : > { %1013 = vst.msk [vmem:[%s2672_s21 + $0x8] sm:$0xff] %vm1011_vm2, %v918_v37  ;;  %v2741_v43 = vadd.f32 %v2478_v14, %v1406_v42 }
 0x196   : > { %2013 = vst.msk [vmem:[%s2466_s10 + $0x100] sm:$0xff] %vm722_vm1, %v2711_v35  ;;  %939 = vrot.lane.b32.xlu2 %v2607_v57, %s2167_s15  ;;  %941 = vrot.lane.b32.xlu0 %v2625_v3, %s2167_s15  ;;  %v677_v46 = vpop.f32.mrf.mxu1 }
 0x197   : > { %2028 = vst.msk [vmem:[%s2466_s10 + $0x178] sm:$0xff] %vm722_vm1, %v2741_v43  ;;  %v2753_v48 = vadd.f32 %v2459_v53, %v677_v46 }
 0x198   : > { %v796_v40 = vpop.permute.xlu2 %795 }
 0x199   : > { %887 = vst.msk [vmem:[%s2644_s18 + $0x20] sm:$0xff] %vm722_vm1, %v796_v40  ;;  %813 = vrot.lane.b32.xlu1 %v2625_v3, %s2166_s12 }
 0x19a   : > { %740 = vst.msk [vmem:[%s2466_s10 + $0x88] sm:$0xff] %vm722_vm1, %v2753_v48 }
 0x19b   : > { %v920_v41 = vpop.permute.xlu1 %919 }
 0x19c   : > { %1014 = vst.msk [vmem:[%s2672_s21 + $0x10] sm:$0xff] %vm1011_vm2, %v920_v41  ;;  %v1409_v49 = vpop.f32.mrf.mxu3 }
 0x19d   : > { %v2765_v51 = vadd.f32 %v2478_v14, %v1409_v49 }
 0x19e   : > { %1673 = vrot.lane.b32.xlu2 %v2615_v50, %s2167_s15  ;;  %1675 = vrot.lane.b32.xlu0 %v2633_v8, %s2167_s15 }
 0x19f   : > { %v680_v56 = vpop.f32.mrf.mxu1  ;;  %2029 = vst.msk [vmem:[%s2466_s10 + $0x180] sm:$0xff] %vm722_vm1, %v2765_v51 }
 0x1a0   : > { %v798_v44 = vpop.permute.xlu2 %797  ;;  %v1527_v45 = vpop.permute.xlu0 %1526  ;;  %v2777_v58 = vadd.f32 %v2459_v53, %v680_v56 }
 0x1a1   : > { %888 = vst.msk [vmem:[%s2644_s18 + $0x28] sm:$0xff] %vm722_vm1, %v798_v44  ;;  %1546 = vrot.lane.b32.xlu1 %v2633_v8, %s2166_s12 }
 0x1a2   : > { %2047 = vst.msk [vmem:[%s2644_s18 + $0x110] sm:$0xff] %vm722_vm1, %v1527_v45 }
 0x1a3   : > { %v1654_v47 = vpop.permute.xlu1 %1653  ;;  %741 = vst.msk [vmem:[%s2466_s10 + $0x90] sm:$0xff] %vm722_vm1, %v2777_v58 }
 0x1a4   : > { %2078 = vst.msk [vmem:[%s2672_s21 + $0x108] sm:$0xff] %vm1011_vm2, %v1654_v47  ;;  %v1412_v59 = vpop.f32.mrf.mxu3 }
 0x1a5   : > { %v2789_v61 = vadd.f32 %v2478_v14, %v1412_v59 }
 0x1a6   : > { %815 = vrot.lane.b32.xlu2 %v2650_v13, %s2166_s12  ;;  %817 = vrot.lane.b32.xlu0 %v2678_v25, %s2166_s12 }
 0x1a7   : > { %v683_v63 = vpop.f32.mrf.mxu1  ;;  %2030 = vst.msk [vmem:[%s2466_s10 + $0x188] sm:$0xff] %vm722_vm1, %v2789_v61 }
 0x1a8   : > { %v1531_v52 = vpop.permute.xlu2 %1530  ;;  %v924_v55 = vpop.permute.xlu0 %923  ;;  %v2801_v1 = vadd.f32 %v2459_v53, %v683_v63 }
 0x1a9   : > { %2049 = vst.msk [vmem:[%s2644_s18 + $0x120] sm:$0xff] %vm722_vm1, %v1531_v52  ;;  %943 = vrot.lane.b32.xlu1 %v2650_v13, %s2167_s15 }
 0x1aa   : > { %1016 = vst.msk [vmem:[%s2672_s21 + $0x20] sm:$0xff] %vm1011_vm2, %v924_v55 }
 0x1ab   : > { %v794_v57 = vpop.permute.xlu1 %793  ;;  %742 = vst.msk [vmem:[%s2466_s10 + $0x98] sm:$0xff] %vm722_vm1, %v2801_v1 }
 0x1ac   : > { %886 = vst.msk [vmem:[%s2644_s18 + $0x18] sm:$0xff] %vm722_vm1, %v794_v57  ;;  %v1415_v2 = vpop.f32.mrf.mxu3 }
 0x1ad   : > { %v2813_v3 = vadd.f32 %v2478_v14, %v1415_v2 }
 0x1ae   : > { %1548 = vrot.lane.b32.xlu2 %v2661_v20, %s2166_s12  ;;  %1550 = vrot.lane.b32.xlu0 %v2691_v31, %s2166_s12 }
 0x1af   : > { %v686_v6 = vpop.f32.mrf.mxu1  ;;  %2031 = vst.msk [vmem:[%s2466_s10 + $0x190] sm:$0xff] %vm722_vm1, %v2813_v3 }
 0x1b0   : > { %v928_v62 = vpop.permute.xlu2 %927  ;;  %v1658_v50 = vpop.permute.xlu0 %1657  ;;  %v2825_v8 = vadd.f32 %v2459_v53, %v686_v6 }
 0x1b1   : > { %1018 = vst.msk [vmem:[%s2672_s21 + $0x30] sm:$0xff] %vm1011_vm2, %v928_v62  ;;  %1677 = vrot.lane.b32.xlu1 %v2661_v20, %s2167_s15 }
 0x1b2   : > { %2080 = vst.msk [vmem:[%s2672_s21 + $0x118] sm:$0xff] %vm1011_vm2, %v1658_v50 }
 0x1b3   : > { %v1529_v0 = vpop.permute.xlu1 %1528  ;;  %743 = vst.msk [vmem:[%s2466_s10 + $0xa0] sm:$0xff] %vm722_vm1, %v2825_v8 }
 0x1b4   : > { %2048 = vst.msk [vmem:[%s2644_s18 + $0x118] sm:$0xff] %vm722_vm1, %v1529_v0  ;;  %v1418_v9 = vpop.f32.mrf.mxu3 }
 0x1b5   : > { %v2837_v10 = vadd.f32 %v2478_v14, %v1418_v9 }
 0x1b6   : > { %945 = vrot.lane.b32.xlu2 %v2678_v25, %s2167_s15  ;;  %787 = vrot.lane.b32.xlu0 %v2694_v33, %s2166_s12 }
 0x1b7   : > { %v689_v13 = vpop.f32.mrf.mxu1  ;;  %2032 = vst.msk [vmem:[%s2466_s10 + $0x198] sm:$0xff] %vm722_vm1, %v2837_v10 }
 0x1b8   : > { %v1662_v4 = vpop.permute.xlu2 %1661  ;;  %v800_v5 = vpop.permute.xlu0 %799  ;;  %v2849_v16 = vadd.f32 %v2459_v53, %v689_v13 }
 0x1b9   : > { %2082 = vst.msk [vmem:[%s2672_s21 + $0x128] sm:$0xff] %vm1011_vm2, %v1662_v4  ;;  %819 = vrot.lane.b32.xlu1 %v2725_v39, %s2166_s12 }
 0x1ba   : > { %889 = vst.msk [vmem:[%s2644_s18 + $0x30] sm:$0xff] %vm722_vm1, %v800_v5 }
 0x1bb   : > { %v926_v7 = vpop.permute.xlu1 %925  ;;  %744 = vst.msk [vmem:[%s2466_s10 + $0xa8] sm:$0xff] %vm722_vm1, %v2849_v16 }
 0x1bc   : > { %1017 = vst.msk [vmem:[%s2672_s21 + $0x28] sm:$0xff] %vm1011_vm2, %v926_v7  ;;  %v1421_v17 = vpop.f32.mrf.mxu3 }
 0x1bd   : > { %v2861_v18 = vadd.f32 %v2478_v14, %v1421_v17 }
 0x1be   : > { %1679 = vrot.lane.b32.xlu2 %v2691_v31, %s2167_s15  ;;  %947 = vrot.lane.b32.xlu0 %v2725_v39, %s2167_s15 }
 0x1bf   : > { %v692_v21 = vpop.f32.mrf.mxu1  ;;  %2033 = vst.msk [vmem:[%s2466_s10 + $0x1a0] sm:$0xff] %vm722_vm1, %v2861_v18 }
 0x1c0   : > { %v804_v11 = vpop.permute.xlu2 %803  ;;  %v1533_v12 = vpop.permute.xlu0 %1532  ;;  %v2873_v23 = vadd.f32 %v2459_v53, %v692_v21 }
 0x1c1   : > { %891 = vst.msk [vmem:[%s2644_s18 + $0x40] sm:$0xff] %vm722_vm1, %v804_v11  ;;  %1522 = vrot.lane.b32.xlu1 %v2711_v35, %s2166_s12 }
 0x1c2   : > { %2050 = vst.msk [vmem:[%s2644_s18 + $0x128] sm:$0xff] %vm722_vm1, %v1533_v12 }
 0x1c3   : > { %v1660_v15 = vpop.permute.xlu1 %1659  ;;  %745 = vst.msk [vmem:[%s2466_s10 + $0xb0] sm:$0xff] %vm722_vm1, %v2873_v23 }
 0x1c4   : > { %2081 = vst.msk [vmem:[%s2672_s21 + $0x120] sm:$0xff] %vm1011_vm2, %v1660_v15  ;;  %v1424_v24 = vpop.f32.mrf.mxu3 }
 0x1c5   : > { %v2885_v54 = vadd.f32 %v2478_v14, %v1424_v24 }
 0x1c6   : > { %915 = vrot.lane.b32.xlu2 %v2694_v33, %s2167_s15  ;;  %1651 = vrot.lane.b32.xlu0 %v2711_v35, %s2167_s15 }
 0x1c7   : > { %v695_v27 = vpop.f32.mrf.mxu1  ;;  %2034 = vst.msk [vmem:[%s2466_s10 + $0x1a8] sm:$0xff] %vm722_vm1, %v2885_v54 }
 0x1c8   : > { %v1537_v19 = vpop.permute.xlu2 %1536  ;;  %v930_v20 = vpop.permute.xlu0 %929  ;;  %v2897_v29 = vadd.f32 %v2459_v53, %v695_v27 }
 0x1c9   : > { %2052 = vst.msk [vmem:[%s2644_s18 + $0x138] sm:$0xff] %vm722_vm1, %v1537_v19  ;;  %1552 = vrot.lane.b32.xlu1 %v2741_v43, %s2166_s12 }
 0x1ca   : > { %1019 = vst.msk [vmem:[%s2672_s21 + $0x38] sm:$0xff] %vm1011_vm2, %v930_v20 }
 0x1cb   : > { %v802_v22 = vpop.permute.xlu1 %801  ;;  %746 = vst.msk [vmem:[%s2466_s10 + $0xb8] sm:$0xff] %vm722_vm1, %v2897_v29 }
 0x1cc   : > { %890 = vst.msk [vmem:[%s2644_s18 + $0x38] sm:$0xff] %vm722_vm1, %v802_v22  ;;  %v1427_v30 = vpop.f32.mrf.mxu3 }
 0x1cd   : > { %v2909_v31 = vadd.f32 %v2478_v14, %v1427_v30 }
 0x1ce   : > { %821 = vrot.lane.b32.xlu2 %v2753_v48, %s2166_s12  ;;  %1681 = vrot.lane.b32.xlu0 %v2741_v43, %s2167_s15 }
 0x1cf   : > { %v698_v60 = vpop.f32.mrf.mxu1  ;;  %2035 = vst.msk [vmem:[%s2466_s10 + $0x1b0] sm:$0xff] %vm722_vm1, %v2909_v31 }
 0x1d0   : > { %v934_v25 = vpop.permute.xlu2 %933  ;;  %v1664_v26 = vpop.permute.xlu0 %1663  ;;  %v2921_v35 = vadd.f32 %v2459_v53, %v698_v60 }
 0x1d1   : > { %1021 = vst.msk [vmem:[%s2672_s21 + $0x48] sm:$0xff] %vm1011_vm2, %v934_v25  ;;  %949 = vrot.lane.b32.xlu1 %v2753_v48, %s2167_s15 }
 0x1d2   : > { %2083 = vst.msk [vmem:[%s2672_s21 + $0x130] sm:$0xff] %vm1011_vm2, %v1664_v26 }
 0x1d3   : > { %v1535_v28 = vpop.permute.xlu1 %1534  ;;  %747 = vst.msk [vmem:[%s2466_s10 + $0xc0] sm:$0xff] %vm722_vm1, %v2921_v35 }
 0x1d4   : > { %2051 = vst.msk [vmem:[%s2644_s18 + $0x130] sm:$0xff] %vm722_vm1, %v1535_v28  ;;  %v1430_v36 = vpop.f32.mrf.mxu3 }
 0x1d5   : > { %v2933_v37 = vadd.f32 %v2478_v14, %v1430_v36 }
 0x1d6   : > { %1554 = vrot.lane.b32.xlu2 %v2765_v51, %s2166_s12  ;;  %823 = vrot.lane.b32.xlu0 %v2777_v58, %s2166_s12 }
 0x1d7   : > { %v701_v40 = vpop.f32.mrf.mxu1  ;;  %2036 = vst.msk [vmem:[%s2466_s10 + $0x1b8] sm:$0xff] %vm722_vm1, %v2933_v37 }
 0x1d8   : > { %v1668_v32 = vpop.permute.xlu2 %1667  ;;  %v806_v33 = vpop.permute.xlu0 %805  ;;  %v2945_v42 = vadd.f32 %v2459_v53, %v701_v40 }
 0x1d9   : > { %2085 = vst.msk [vmem:[%s2672_s21 + $0x140] sm:$0xff] %vm1011_vm2, %v1668_v32  ;;  %1683 = vrot.lane.b32.xlu1 %v2765_v51, %s2167_s15 }
 0x1da   : > { %892 = vst.msk [vmem:[%s2644_s18 + $0x48] sm:$0xff] %vm722_vm1, %v806_v33 }
 0x1db   : > { %v932_v34 = vpop.permute.xlu1 %931  ;;  %748 = vst.msk [vmem:[%s2466_s10 + $0xc8] sm:$0xff] %vm722_vm1, %v2945_v42 }
 0x1dc   : > { %1020 = vst.msk [vmem:[%s2672_s21 + $0x40] sm:$0xff] %vm1011_vm2, %v932_v34  ;;  %v1433_v43 = vpop.f32.mrf.mxu3 }
 0x1dd   : > { %v2957_v44 = vadd.f32 %v2478_v14, %v1433_v43 }
 0x1de   : > { %951 = vrot.lane.b32.xlu2 %v2777_v58, %s2167_s15  ;;  %1556 = vrot.lane.b32.xlu0 %v2789_v61, %s2166_s12 }
 0x1df   : > { %v704_v47 = vpop.f32.mrf.mxu1  ;;  %2037 = vst.msk [vmem:[%s2466_s10 + $0x1c0] sm:$0xff] %vm722_vm1, %v2957_v44 }
 0x1e0   : > { %v810_v38 = vpop.permute.xlu2 %809  ;;  %v1539_v39 = vpop.permute.xlu0 %1538  ;;  %v2969_v49 = vadd.f32 %v2459_v53, %v704_v47 }
 0x1e1   : > { %894 = vst.msk [vmem:[%s2644_s18 + $0x58] sm:$0xff] %vm722_vm1, %v810_v38  ;;  %825 = vrot.lane.b32.xlu1 %v2801_v1, %s2166_s12 }
 0x1e2   : > { %2053 = vst.msk [vmem:[%s2644_s18 + $0x140] sm:$0xff] %vm722_vm1, %v1539_v39 }
 0x1e3   : > { %v1666_v41 = vpop.permute.xlu1 %1665  ;;  %749 = vst.msk [vmem:[%s2466_s10 + $0xd0] sm:$0xff] %vm722_vm1, %v2969_v49 }
 0x1e4   : > { %2084 = vst.msk [vmem:[%s2672_s21 + $0x138] sm:$0xff] %vm1011_vm2, %v1666_v41  ;;  %v1436_v51 = vpop.f32.mrf.mxu3 }
 0x1e5   : > { %v2981_v52 = vadd.f32 %v2478_v14, %v1436_v51 }
 0x1e6   : > { %1685 = vrot.lane.b32.xlu2 %v2789_v61, %s2167_s15  ;;  %953 = vrot.lane.b32.xlu0 %v2801_v1, %s2167_s15 }
 0x1e7   : > { %v707_v57 = vpop.f32.mrf.mxu1  ;;  %2038 = vst.msk [vmem:[%s2466_s10 + $0x1c8] sm:$0xff] %vm722_vm1, %v2981_v52 }
 0x1e8   : > { %v1543_v45 = vpop.permute.xlu2 %1542  ;;  %v936_v46 = vpop.permute.xlu0 %935  ;;  %v2993_v59 = vadd.f32 %v2459_v53, %v707_v57 }
 0x1e9   : > { %2055 = vst.msk [vmem:[%s2644_s18 + $0x150] sm:$0xff] %vm722_vm1, %v1543_v45  ;;  %1558 = vrot.lane.b32.xlu1 %v2813_v3, %s2166_s12 }
 0x1ea   : > { %1022 = vst.msk [vmem:[%s2672_s21 + $0x50] sm:$0xff] %vm1011_vm2, %v936_v46 }
 0x1eb   : > { %v808_v48 = vpop.permute.xlu1 %807  ;;  %750 = vst.msk [vmem:[%s2466_s10 + $0xd8] sm:$0xff] %vm722_vm1, %v2993_v59 }
 0x1ec   : > { %893 = vst.msk [vmem:[%s2644_s18 + $0x50] sm:$0xff] %vm722_vm1, %v808_v48  ;;  %v1439_v61 = vpop.f32.mrf.mxu3 }
 0x1ed   : > { %v3005_v62 = vadd.f32 %v2478_v14, %v1439_v61 }
 0x1ee   : > { %827 = vrot.lane.b32.xlu2 %v2825_v8, %s2166_s12  ;;  %1687 = vrot.lane.b32.xlu0 %v2813_v3, %s2167_s15 }
 0x1ef   : > { %v710_v0 = vpop.f32.mrf.mxu1  ;;  %2039 = vst.msk [vmem:[%s2466_s10 + $0x1d0] sm:$0xff] %vm722_vm1, %v3005_v62 }
 0x1f0   : > { %v940_v55 = vpop.permute.xlu2 %939  ;;  %v1670_v56 = vpop.permute.xlu0 %1669  ;;  %v3017_v2 = vadd.f32 %v2459_v53, %v710_v0 }
 0x1f1   : > { %1024 = vst.msk [vmem:[%s2672_s21 + $0x60] sm:$0xff] %vm1011_vm2, %v940_v55  ;;  %955 = vrot.lane.b32.xlu1 %v2825_v8, %s2167_s15 }
 0x1f2   : > { %2086 = vst.msk [vmem:[%s2672_s21 + $0x148] sm:$0xff] %vm1011_vm2, %v1670_v56 }
 0x1f3   : > { %v1541_v58 = vpop.permute.xlu1 %1540  ;;  %751 = vst.msk [vmem:[%s2466_s10 + $0xe0] sm:$0xff] %vm722_vm1, %v3017_v2 }
 0x1f4   : > { %2054 = vst.msk [vmem:[%s2644_s18 + $0x148] sm:$0xff] %vm722_vm1, %v1541_v58  ;;  %v1442_v3 = vpop.f32.mrf.mxu3 }
 0x1f5   : > { %v3029_v4 = vadd.f32 %v2478_v14, %v1442_v3 }
 0x1f6   : > { %1560 = vrot.lane.b32.xlu2 %v2837_v10, %s2166_s12  ;;  %829 = vrot.lane.b32.xlu0 %v2849_v16, %s2166_s12 }
 0x1f7   : > { %v713_v7 = vpop.f32.mrf.mxu1  ;;  %2040 = vst.msk [vmem:[%s2466_s10 + $0x1d8] sm:$0xff] %vm722_vm1, %v3029_v4 }
 0x1f8   : > { %v1674_v50 = vpop.permute.xlu2 %1673  ;;  %v812_v63 = vpop.permute.xlu0 %811  ;;  %v3041_v9 = vadd.f32 %v2459_v53, %v713_v7 }
 0x1f9   : > { %2088 = vst.msk [vmem:[%s2672_s21 + $0x158] sm:$0xff] %vm1011_vm2, %v1674_v50  ;;  %1689 = vrot.lane.b32.xlu1 %v2837_v10, %s2167_s15 }
 0x1fa   : > { %895 = vst.msk [vmem:[%s2644_s18 + $0x60] sm:$0xff] %vm722_vm1, %v812_v63 }
 0x1fb   : > { %v938_v1 = vpop.permute.xlu1 %937  ;;  %752 = vst.msk [vmem:[%s2466_s10 + $0xe8] sm:$0xff] %vm722_vm1, %v3041_v9 }
 0x1fc   : > { %1023 = vst.msk [vmem:[%s2672_s21 + $0x58] sm:$0xff] %vm1011_vm2, %v938_v1  ;;  %v1445_v10 = vpop.f32.mrf.mxu3 }
 0x1fd   : > { %v3053_v11 = vadd.f32 %v2478_v14, %v1445_v10 }
 0x1fe   : > { %957 = vrot.lane.b32.xlu2 %v2849_v16, %s2167_s15  ;;  %1562 = vrot.lane.b32.xlu0 %v2861_v18, %s2166_s12 }
 0x1ff   : > { %v716_v15 = vpop.f32.mrf.mxu1  ;;  %2041 = vst.msk [vmem:[%s2466_s10 + $0x1e0] sm:$0xff] %vm722_vm1, %v3053_v11 }
 0x200   : > { %v816_v5 = vpop.permute.xlu2 %815  ;;  %v1545_v6 = vpop.permute.xlu0 %1544  ;;  %v3065_v17 = vadd.f32 %v2459_v53, %v716_v15 }
 0x201   : > { %897 = vst.msk [vmem:[%s2644_s18 + $0x70] sm:$0xff] %vm722_vm1, %v816_v5  ;;  %831 = vrot.lane.b32.xlu1 %v2873_v23, %s2166_s12 }
 0x202   : > { %2056 = vst.msk [vmem:[%s2644_s18 + $0x158] sm:$0xff] %vm722_vm1, %v1545_v6 }
 0x203   : > { %v1672_v8 = vpop.permute.xlu1 %1671  ;;  %753 = vst.msk [vmem:[%s2466_s10 + $0xf0] sm:$0xff] %vm722_vm1, %v3065_v17 }
 0x204   : > { %2087 = vst.msk [vmem:[%s2672_s21 + $0x150] sm:$0xff] %vm1011_vm2, %v1672_v8 }
 0x206   : > { %1691 = vrot.lane.b32.xlu2 %v2861_v18, %s2167_s15  ;;  %959 = vrot.lane.b32.xlu0 %v2873_v23, %s2167_s15  ;;  %v1448_v18 = vpop.f32.mrf.mxu3  ;;  %v2157_v23 = vld [vmem:[%s3339_s4] ss:$0 sm:$0xff] }
 0x207   : > { %v3077_v19 = vadd.f32 %v2478_v14, %v1448_v18  ;;  %v719_v21 = vpop.f32.mrf.mxu1 }
 0x208   : > { %v1549_v12 = vpop.permute.xlu2 %1548  ;;  %v942_v13 = vpop.permute.xlu0 %941  ;;  %v3091_v24 = vadd.f32 %v2157_v23, %v719_v21 }
 0x209   : > { %2058 = vst.msk [vmem:[%s2644_s18 + $0x168] sm:$0xff] %vm722_vm1, %v1549_v12  ;;  %1564 = vrot.lane.b32.xlu1 %v2885_v54, %s2166_s12 }
 0x20a   : > { %1025 = vst.msk [vmem:[%s2672_s21 + $0x68] sm:$0xff] %vm1011_vm2, %v942_v13 }
 0x20b   : > { %v814_v16 = vpop.permute.xlu1 %813  ;;  %2042 = vst.msk [vmem:[%s2466_s10 + $0x1e8] sm:$0xff] %vm722_vm1, %v3077_v19 }
 0x20c   : > { %896 = vst.msk [vmem:[%s2644_s18 + $0x68] sm:$0xff] %vm722_vm1, %v814_v16 }
 0x20d   : > { %754 = vst.msk [vmem:[%s2466_s10 + $0xf8] sm:$0xff] %vm722_vm1, %v3091_v24 }
 0x20e   : > { %833 = vrot.lane.b32.xlu2 %v2897_v29, %s2166_s12  ;;  %1693 = vrot.lane.b32.xlu0 %v2885_v54, %s2167_s15  ;;  %v1451_v54 = vpop.f32.mrf.mxu3 }
 0x20f   : > { %v3103_v25 = vadd.f32 %v2478_v14, %v1451_v54 }
 0x210   : > { %v946_v20 = vpop.permute.xlu2 %945  ;;  %v1676_v53 = vpop.permute.xlu0 %1675 }
 0x211   : > { %1027 = vst.msk [vmem:[%s2672_s21 + $0x78] sm:$0xff] %vm1011_vm2, %v946_v20  ;;  %961 = vrot.lane.b32.xlu1 %v2897_v29, %s2167_s15 }
 0x212   : > { %2089 = vst.msk [vmem:[%s2672_s21 + $0x160] sm:$0xff] %vm1011_vm2, %v1676_v53 }
 0x213   : > { %v1547_v22 = vpop.permute.xlu1 %1546  ;;  %2043 = vst.msk [vmem:[%s2466_s10 + $0x1f0] sm:$0xff] %vm722_vm1, %v3103_v25 }
 0x214   : > { %2057 = vst.msk [vmem:[%s2644_s18 + $0x160] sm:$0xff] %vm722_vm1, %v1547_v22 }
 0x216   : > { %1566 = vrot.lane.b32.xlu2 %v2909_v31, %s2166_s12  ;;  %835 = vrot.lane.b32.xlu0 %v2921_v35, %s2166_s12  ;;  %v1454_v29 = vpop.f32.mrf.mxu3 }
 0x217   : > { %v3121_v30 = vadd.f32 %v2478_v14, %v1454_v29 }
 0x218   : > { %v1680_v26 = vpop.permute.xlu2 %1679  ;;  %v818_v27 = vpop.permute.xlu0 %817 }
 0x219   : > { %2091 = vst.msk [vmem:[%s2672_s21 + $0x170] sm:$0xff] %vm1011_vm2, %v1680_v26  ;;  %1695 = vrot.lane.b32.xlu1 %v2909_v31, %s2167_s15 }
 0x21a   : > { %898 = vst.msk [vmem:[%s2644_s18 + $0x78] sm:$0xff] %vm722_vm1, %v818_v27 }
 0x21b   : > { %v944_v28 = vpop.permute.xlu1 %943  ;;  %2044 = vst.msk [vmem:[%s2466_s10 + $0x1f8] sm:$0xff] %vm722_vm1, %v3121_v30 }
 0x21c   : > { %1026 = vst.msk [vmem:[%s2672_s21 + $0x70] sm:$0xff] %vm1011_vm2, %v944_v28 }
 0x21e   : > { %963 = vrot.lane.b32.xlu2 %v2921_v35, %s2167_s15  ;;  %1568 = vrot.lane.b32.xlu0 %v2933_v37, %s2166_s12 }
 0x220   : > { %v1551_v31 = vpop.permute.xlu0 %1550  ;;  %v916_v32 = vpop.permute.xlu2 %915 }
 0x221   : > { %2059 = vst.msk [vmem:[%s2644_s18 + $0x170] sm:$0xff] %vm722_vm1, %v1551_v31  ;;  %837 = vrot.lane.b32.xlu1 %v2945_v42, %s2166_s12 }
 0x222   : > { %1012 = vst.msk [vmem:[%s2672_s21] sm:$0xff] %vm1011_vm2, %v916_v32 }
 0x223   : > { %v1678_v33 = vpop.permute.xlu1 %1677 }
 0x224   : > { %2090 = vst.msk [vmem:[%s2672_s21 + $0x168] sm:$0xff] %vm1011_vm2, %v1678_v33 }
 0x226   : > { %1697 = vrot.lane.b32.xlu2 %v2933_v37, %s2167_s15  ;;  %965 = vrot.lane.b32.xlu0 %v2945_v42, %s2167_s15 }
 0x228   : > { %v822_v14 = vpop.permute.xlu2 %821  ;;  %v788_v60 = vpop.permute.xlu0 %787 }
 0x229   : > { %900 = vst.msk [vmem:[%s2644_s18 + $0x88] sm:$0xff] %vm722_vm1, %v822_v14  ;;  %1570 = vrot.lane.b32.xlu1 %v2957_v44, %s2166_s12 }
 0x22a   : > { %883 = vst.msk [vmem:[%s2644_s18] sm:$0xff] %vm722_vm1, %v788_v60 }
 0x22b   : > { %v820_v34 = vpop.permute.xlu1 %819 }
 0x22c   : > { %899 = vst.msk [vmem:[%s2644_s18 + $0x80] sm:$0xff] %vm722_vm1, %v820_v34 }
 0x22e   : > { %839 = vrot.lane.b32.xlu2 %v2969_v49, %s2166_s12  ;;  %1699 = vrot.lane.b32.xlu0 %v2957_v44, %s2167_s15 }
 0x230   : > { %v1555_v35 = vpop.permute.xlu2 %1554  ;;  %v948_v36 = vpop.permute.xlu0 %947 }
 0x231   : > { %2061 = vst.msk [vmem:[%s2644_s18 + $0x180] sm:$0xff] %vm722_vm1, %v1555_v35  ;;  %967 = vrot.lane.b32.xlu1 %v2969_v49, %s2167_s15 }
 0x232   : > { %1028 = vst.msk [vmem:[%s2672_s21 + $0x80] sm:$0xff] %vm1011_vm2, %v948_v36 }
 0x233   : > { %v1523_v37 = vpop.permute.xlu1 %1522 }
 0x234   : > { %2045 = vst.msk [vmem:[%s2644_s18 + $0x100] sm:$0xff] %vm722_vm1, %v1523_v37 }
 0x236   : > { %1572 = vrot.lane.b32.xlu2 %v2981_v52, %s2166_s12  ;;  %841 = vrot.lane.b32.xlu0 %v2993_v59, %s2166_s12 }
 0x238   : > { %v952_v38 = vpop.permute.xlu2 %951  ;;  %v1652_v39 = vpop.permute.xlu0 %1651 }
 0x239   : > { %1030 = vst.msk [vmem:[%s2672_s21 + $0x90] sm:$0xff] %vm1011_vm2, %v952_v38  ;;  %1701 = vrot.lane.b32.xlu1 %v2981_v52, %s2167_s15 }
 0x23a   : > { %2077 = vst.msk [vmem:[%s2672_s21 + $0x100] sm:$0xff] %vm1011_vm2, %v1652_v39 }
 0x23b   : > { %v1553_v40 = vpop.permute.xlu1 %1552 }
 0x23c   : > { %2060 = vst.msk [vmem:[%s2644_s18 + $0x178] sm:$0xff] %vm722_vm1, %v1553_v40 }
 0x23e   : > { %969 = vrot.lane.b32.xlu2 %v2993_v59, %s2167_s15  ;;  %1574 = vrot.lane.b32.xlu0 %v3005_v62, %s2166_s12 }
 0x240   : > { %v1686_v41 = vpop.permute.xlu2 %1685  ;;  %v1682_v42 = vpop.permute.xlu0 %1681 }
 0x241   : > { %2094 = vst.msk [vmem:[%s2672_s21 + $0x188] sm:$0xff] %vm1011_vm2, %v1686_v41  ;;  %843 = vrot.lane.b32.xlu1 %v3017_v2, %s2166_s12 }
 0x242   : > { %2092 = vst.msk [vmem:[%s2672_s21 + $0x178] sm:$0xff] %vm1011_vm2, %v1682_v42 }
 0x243   : > { %v950_v43 = vpop.permute.xlu1 %949 }
 0x244   : > { %1029 = vst.msk [vmem:[%s2672_s21 + $0x88] sm:$0xff] %vm1011_vm2, %v950_v43 }
 0x246   : > { %1703 = vrot.lane.b32.xlu2 %v3005_v62, %s2167_s15  ;;  %971 = vrot.lane.b32.xlu0 %v3017_v2, %s2167_s15 }
 0x248   : > { %v828_v44 = vpop.permute.xlu2 %827  ;;  %v824_v45 = vpop.permute.xlu0 %823 }
 0x249   : > { %903 = vst.msk [vmem:[%s2644_s18 + $0xa0] sm:$0xff] %vm722_vm1, %v828_v44  ;;  %1576 = vrot.lane.b32.xlu1 %v3029_v4, %s2166_s12 }
 0x24a   : > { %901 = vst.msk [vmem:[%s2644_s18 + $0x90] sm:$0xff] %vm722_vm1, %v824_v45 }
 0x24b   : > { %v1684_v46 = vpop.permute.xlu1 %1683 }
 0x24c   : > { %2093 = vst.msk [vmem:[%s2672_s21 + $0x180] sm:$0xff] %vm1011_vm2, %v1684_v46 }
 0x24e   : > { %845 = vrot.lane.b32.xlu2 %v3041_v9, %s2166_s12  ;;  %1705 = vrot.lane.b32.xlu0 %v3029_v4, %s2167_s15 }
 0x250   : > { %v1561_v47 = vpop.permute.xlu2 %1560  ;;  %v1557_v48 = vpop.permute.xlu0 %1556 }
 0x251   : > { %2064 = vst.msk [vmem:[%s2644_s18 + $0x198] sm:$0xff] %vm722_vm1, %v1561_v47  ;;  %973 = vrot.lane.b32.xlu1 %v3041_v9, %s2167_s15 }
 0x252   : > { %2062 = vst.msk [vmem:[%s2644_s18 + $0x188] sm:$0xff] %vm722_vm1, %v1557_v48 }
 0x253   : > { %v826_v49 = vpop.permute.xlu1 %825 }
 0x254   : > { %902 = vst.msk [vmem:[%s2644_s18 + $0x98] sm:$0xff] %vm722_vm1, %v826_v49 }
 0x256   : > { %1578 = vrot.lane.b32.xlu2 %v3053_v11, %s2166_s12  ;;  %847 = vrot.lane.b32.xlu0 %v3065_v17, %s2166_s12 }
 0x258   : > { %v958_v51 = vpop.permute.xlu2 %957  ;;  %v954_v52 = vpop.permute.xlu0 %953 }
 0x259   : > { %1033 = vst.msk [vmem:[%s2672_s21 + $0xa8] sm:$0xff] %vm1011_vm2, %v958_v51  ;;  %1707 = vrot.lane.b32.xlu1 %v3053_v11, %s2167_s15 }
 0x25a   : > { %1031 = vst.msk [vmem:[%s2672_s21 + $0x98] sm:$0xff] %vm1011_vm2, %v954_v52 }
 0x25b   : > { %v1559_v55 = vpop.permute.xlu1 %1558 }
 0x25c   : > { %2063 = vst.msk [vmem:[%s2644_s18 + $0x190] sm:$0xff] %vm722_vm1, %v1559_v55 }
 0x25e   : > { %975 = vrot.lane.b32.xlu2 %v3065_v17, %s2167_s15  ;;  %1580 = vrot.lane.b32.xlu0 %v3077_v19, %s2166_s12 }
 0x260   : > { %v1692_v56 = vpop.permute.xlu2 %1691  ;;  %v1688_v57 = vpop.permute.xlu0 %1687 }
 0x261   : > { %2097 = vst.msk [vmem:[%s2672_s21 + $0x1a0] sm:$0xff] %vm1011_vm2, %v1692_v56  ;;  %849 = vrot.lane.b32.xlu1 %v3091_v24, %s2166_s12 }
 0x262   : > { %2095 = vst.msk [vmem:[%s2672_s21 + $0x190] sm:$0xff] %vm1011_vm2, %v1688_v57 }
 0x263   : > { %v956_v58 = vpop.permute.xlu1 %955 }
 0x264   : > { %1032 = vst.msk [vmem:[%s2672_s21 + $0xa0] sm:$0xff] %vm1011_vm2, %v956_v58 }
 0x266   : > { %1584 = vrot.lane.b32.xlu2 %v3121_v30, %s2166_s12  ;;  %977 = vrot.lane.b32.xlu0 %v3091_v24, %s2167_s15 }
 0x268   : > { %v834_v59 = vpop.permute.xlu2 %833  ;;  %v830_v61 = vpop.permute.xlu0 %829 }
 0x269   : > { %906 = vst.msk [vmem:[%s2644_s18 + $0xb8] sm:$0xff] %vm722_vm1, %v834_v59  ;;  %1582 = vrot.lane.b32.xlu1 %v3103_v25, %s2166_s12 }
 0x26a   : > { %904 = vst.msk [vmem:[%s2644_s18 + $0xa8] sm:$0xff] %vm722_vm1, %v830_v61 }
 0x26b   : > { %v1690_v62 = vpop.permute.xlu1 %1689 }
 0x26c   : > { %2096 = vst.msk [vmem:[%s2672_s21 + $0x198] sm:$0xff] %vm1011_vm2, %v1690_v62 }
 0x26e   : > { %1709 = vrot.lane.b32.xlu2 %v3077_v19, %s2167_s15  ;;  %1711 = vrot.lane.b32.xlu0 %v3103_v25, %s2167_s15 }
 0x270   : > { %v1567_v50 = vpop.permute.xlu2 %1566  ;;  %v1563_v63 = vpop.permute.xlu0 %1562 }
 0x271   : > { %2067 = vst.msk [vmem:[%s2644_s18 + $0x1b0] sm:$0xff] %vm722_vm1, %v1567_v50  ;;  %1713 = vrot.lane.b32.xlu1 %v3121_v30, %s2167_s15 }
 0x272   : > { %2065 = vst.msk [vmem:[%s2644_s18 + $0x1a0] sm:$0xff] %vm722_vm1, %v1563_v63 }
 0x273   : > { %v832_v0 = vpop.permute.xlu1 %831 }
 0x274   : > { %905 = vst.msk [vmem:[%s2644_s18 + $0xb0] sm:$0xff] %vm722_vm1, %v832_v0 }
 0x278   : > { %v964_v1 = vpop.permute.xlu2 %963  ;;  %v960_v2 = vpop.permute.xlu0 %959 }
 0x279   : > { %1036 = vst.msk [vmem:[%s2672_s21 + $0xc0] sm:$0xff] %vm1011_vm2, %v964_v1 }
 0x27a   : > { %1034 = vst.msk [vmem:[%s2672_s21 + $0xb0] sm:$0xff] %vm1011_vm2, %v960_v2 }
 0x27b   : > { %v1565_v3 = vpop.permute.xlu1 %1564 }
 0x27c   : > { %2066 = vst.msk [vmem:[%s2644_s18 + $0x1a8] sm:$0xff] %vm722_vm1, %v1565_v3 }
 0x280   : > { %v1698_v4 = vpop.permute.xlu2 %1697  ;;  %v1694_v5 = vpop.permute.xlu0 %1693 }
 0x281   : > { %2100 = vst.msk [vmem:[%s2672_s21 + $0x1b8] sm:$0xff] %vm1011_vm2, %v1698_v4 }
 0x282   : > { %2098 = vst.msk [vmem:[%s2672_s21 + $0x1a8] sm:$0xff] %vm1011_vm2, %v1694_v5 }
 0x283   : > { %v962_v6 = vpop.permute.xlu1 %961 }
 0x284   : > { %1035 = vst.msk [vmem:[%s2672_s21 + $0xb8] sm:$0xff] %vm1011_vm2, %v962_v6 }
 0x288   : > { %v840_v7 = vpop.permute.xlu2 %839  ;;  %v836_v8 = vpop.permute.xlu0 %835 }
 0x289   : > { %909 = vst.msk [vmem:[%s2644_s18 + $0xd0] sm:$0xff] %vm722_vm1, %v840_v7 }
 0x28a   : > { %907 = vst.msk [vmem:[%s2644_s18 + $0xc0] sm:$0xff] %vm722_vm1, %v836_v8 }
 0x28b   : > { %v1696_v9 = vpop.permute.xlu1 %1695 }
 0x28c   : > { %2099 = vst.msk [vmem:[%s2672_s21 + $0x1b0] sm:$0xff] %vm1011_vm2, %v1696_v9 }
 0x290   : > { %v1573_v10 = vpop.permute.xlu2 %1572  ;;  %v1569_v11 = vpop.permute.xlu0 %1568 }
 0x291   : > { %2070 = vst.msk [vmem:[%s2644_s18 + $0x1c8] sm:$0xff] %vm722_vm1, %v1573_v10 }
 0x292   : > { %2068 = vst.msk [vmem:[%s2644_s18 + $0x1b8] sm:$0xff] %vm722_vm1, %v1569_v11 }
 0x293   : > { %v838_v12 = vpop.permute.xlu1 %837 }
 0x294   : > { %908 = vst.msk [vmem:[%s2644_s18 + $0xc8] sm:$0xff] %vm722_vm1, %v838_v12 }
 0x298   : > { %v970_v13 = vpop.permute.xlu2 %969  ;;  %v966_v15 = vpop.permute.xlu0 %965 }
 0x299   : > { %1039 = vst.msk [vmem:[%s2672_s21 + $0xd8] sm:$0xff] %vm1011_vm2, %v970_v13 }
 0x29a   : > { %1037 = vst.msk [vmem:[%s2672_s21 + $0xc8] sm:$0xff] %vm1011_vm2, %v966_v15 }
 0x29b   : > { %v1571_v16 = vpop.permute.xlu1 %1570 }
 0x29c   : > { %2069 = vst.msk [vmem:[%s2644_s18 + $0x1c0] sm:$0xff] %vm722_vm1, %v1571_v16 }
 0x2a0   : > { %v1704_v17 = vpop.permute.xlu2 %1703  ;;  %v1700_v18 = vpop.permute.xlu0 %1699 }
 0x2a1   : > { %2103 = vst.msk [vmem:[%s2672_s21 + $0x1d0] sm:$0xff] %vm1011_vm2, %v1704_v17 }
 0x2a2   : > { %2101 = vst.msk [vmem:[%s2672_s21 + $0x1c0] sm:$0xff] %vm1011_vm2, %v1700_v18 }
 0x2a3   : > { %v968_v19 = vpop.permute.xlu1 %967 }
 0x2a4   : > { %1038 = vst.msk [vmem:[%s2672_s21 + $0xd0] sm:$0xff] %vm1011_vm2, %v968_v19 }
 0x2a8   : > { %v846_v20 = vpop.permute.xlu2 %845  ;;  %v842_v53 = vpop.permute.xlu0 %841 }
 0x2a9   : > { %912 = vst.msk [vmem:[%s2644_s18 + $0xe8] sm:$0xff] %vm722_vm1, %v846_v20 }
 0x2aa   : > { %910 = vst.msk [vmem:[%s2644_s18 + $0xd8] sm:$0xff] %vm722_vm1, %v842_v53 }
 0x2ab   : > { %v1702_v21 = vpop.permute.xlu1 %1701 }
 0x2ac   : > { %2102 = vst.msk [vmem:[%s2672_s21 + $0x1c8] sm:$0xff] %vm1011_vm2, %v1702_v21 }
 0x2b0   : > { %v1579_v22 = vpop.permute.xlu2 %1578  ;;  %v1575_v23 = vpop.permute.xlu0 %1574 }
 0x2b1   : > { %2073 = vst.msk [vmem:[%s2644_s18 + $0x1e0] sm:$0xff] %vm722_vm1, %v1579_v22 }
 0x2b2   : > { %2071 = vst.msk [vmem:[%s2644_s18 + $0x1d0] sm:$0xff] %vm722_vm1, %v1575_v23 }
 0x2b3   : > { %v844_v24 = vpop.permute.xlu1 %843 }
 0x2b4   : > { %911 = vst.msk [vmem:[%s2644_s18 + $0xe0] sm:$0xff] %vm722_vm1, %v844_v24 }
 0x2b8   : > { %v976_v54 = vpop.permute.xlu2 %975  ;;  %v972_v25 = vpop.permute.xlu0 %971 }
 0x2b9   : > { %1042 = vst.msk [vmem:[%s2672_s21 + $0xf0] sm:$0xff] %vm1011_vm2, %v976_v54 }
 0x2ba   : > { %1040 = vst.msk [vmem:[%s2672_s21 + $0xe0] sm:$0xff] %vm1011_vm2, %v972_v25 }
 0x2bb   : > { %v1577_v26 = vpop.permute.xlu1 %1576 }
 0x2bc   : > { %2072 = vst.msk [vmem:[%s2644_s18 + $0x1d8] sm:$0xff] %vm722_vm1, %v1577_v26 }
 0x2c0   : > { %v1585_v27 = vpop.permute.xlu2 %1584  ;;  %v1706_v28 = vpop.permute.xlu0 %1705 }
 0x2c1   : > { %2076 = vst.msk [vmem:[%s2644_s18 + $0x1f8] sm:$0xff] %vm722_vm1, %v1585_v27 }
 0x2c2   : > { %2104 = vst.msk [vmem:[%s2672_s21 + $0x1d8] sm:$0xff] %vm1011_vm2, %v1706_v28 }
 0x2c3   : > { %v974_v29 = vpop.permute.xlu1 %973 }
 0x2c4   : > { %1041 = vst.msk [vmem:[%s2672_s21 + $0xe8] sm:$0xff] %vm1011_vm2, %v974_v29 }
 0x2c8   : > { %v1710_v30 = vpop.permute.xlu2 %1709  ;;  %v848_v31 = vpop.permute.xlu0 %847 }
 0x2c9   : > { %2106 = vst.msk [vmem:[%s2672_s21 + $0x1e8] sm:$0xff] %vm1011_vm2, %v1710_v30 }
 0x2ca   : > { %913 = vst.msk [vmem:[%s2644_s18 + $0xf0] sm:$0xff] %vm722_vm1, %v848_v31 }
 0x2cb   : > { %v1708_v32 = vpop.permute.xlu1 %1707 }
 0x2cc   : > { %2105 = vst.msk [vmem:[%s2672_s21 + $0x1e0] sm:$0xff] %vm1011_vm2, %v1708_v32 }
 0x2d0   : > { %v1581_v33 = vpop.permute.xlu0 %1580 }
 0x2d1   : > { %2074 = vst.msk [vmem:[%s2644_s18 + $0x1e8] sm:$0xff] %vm722_vm1, %v1581_v33 }
 0x2d3   : > { %v850_v14 = vpop.permute.xlu1 %849 }
 0x2d4   : > { %914 = vst.msk [vmem:[%s2644_s18 + $0xf8] sm:$0xff] %vm722_vm1, %v850_v14 }
 0x2d8   : > { %v978_v60 = vpop.permute.xlu0 %977 }
 0x2d9   : > { %1043 = vst.msk [vmem:[%s2672_s21 + $0xf8] sm:$0xff] %vm1011_vm2, %v978_v60 }
 0x2db   : > { %v1583_v34 = vpop.permute.xlu1 %1582 }
 0x2dc   : > { %2075 = vst.msk [vmem:[%s2644_s18 + $0x1f0] sm:$0xff] %vm722_vm1, %v1583_v34 }
 0x2e0   : > { %v1712_v35 = vpop.permute.xlu0 %1711 }
 0x2e1   : > { %2107 = vst.msk [vmem:[%s2672_s21 + $0x1f0] sm:$0xff] %vm1011_vm2, %v1712_v35 }
 0x2e3   : > { %v1714_v36 = vpop.permute.xlu1 %1713 }
 0x2e4   : > { %2108 = vst.msk [vmem:[%s2672_s21 + $0x1f8] sm:$0xff] %vm1011_vm2, %v1714_v36 }
 0x2e5 PF: > { %s18_s24 = sadd.s32 1, %s2164_s24  }
 0x2e6   : > { %p15_p4 = scmp.ge.s32.totalorder %s18_s24, 4  }
 0x2e8   :  { %17 = sbr.rel (!%p15_p4) target bundleno = 1 (0x1), region = 98 }

</bundles_post_ra>
